<compile_context>
chip_gen: v6e
topology: v6e:2x2x1
jax: 0.10.0
libtpu: 0.0.40
codegen_flags: <defaults>
</compile_context>

<pallas_src>
import functools
import math

import jax
import jax.numpy as jnp
from jax.experimental import pallas as pl
from jax.experimental.pallas import tpu as pltpu

LANE = 128
_VMEM_LIMIT = 32 * 1024 * 1024  # explicit, safe on v5e/v6e/v7x; tiles are small


# ----------------------------------------------------------------------------
# Small helpers (padding / tiling)
# ----------------------------------------------------------------------------
def _round_up(x, m):
    return ((x + m - 1) // m) * m


def _pick_tile(n):
    # largest of (512, 256, 128) that divides n (n is always a multiple of 128)
    for t in (512, 256, 128):
        if n >= t and n % t == 0:
            return t
    return n


def _pad2(x, rows, cols):
    r, c = x.shape
    return jnp.pad(x, ((0, rows - r), (0, cols - c)))


# ----------------------------------------------------------------------------
# Pallas kernels
# ----------------------------------------------------------------------------
def _linear_kernel(x_ref, w_ref, b_ref, o_ref, acc_ref, *, relu):
    # act(X @ W + b), tiled over (row tiles, K tiles); K (reduction) is last.
    k = pl.program_id(1)

    @pl.when(k == 0)
    def _():
        acc_ref[...] = jnp.zeros_like(acc_ref)

    acc_ref[...] += jnp.dot(
        x_ref[...].astype(jnp.bfloat16),
        w_ref[...].astype(jnp.bfloat16),
        preferred_element_type=jnp.float32)

    @pl.when(k == pl.num_programs(1) - 1)
    def _():
        out = acc_ref[...] + b_ref[...]
        if relu:
            out = jnp.maximum(out, 0.0)
        o_ref[...] = out


def _gcn_layer_body(a_ref, h_blk, w_ref, b_ref, o_ref, acc_ref):
    # acc += A[i, k] @ (H_k @ W);  epilogue: relu(acc + b)
    k = pl.program_id(1)

    @pl.when(k == 0)
    def _():
        acc_ref[...] = jnp.zeros_like(acc_ref)

    xw = jnp.dot(h_blk.astype(jnp.bfloat16),
                 w_ref[...].astype(jnp.bfloat16),
                 preferred_element_type=jnp.float32)
    acc_ref[...] += jnp.dot(a_ref[...].astype(jnp.bfloat16),
                            xw.astype(jnp.bfloat16),
                            preferred_element_type=jnp.float32)

    @pl.when(k == pl.num_programs(1) - 1)
    def _():
        o_ref[...] = jnp.maximum(acc_ref[...] + b_ref[...], 0.0)


def _gcn_layer_plain_kernel(a_ref, h_ref, w_ref, b_ref, o_ref, acc_ref):
    _gcn_layer_body(a_ref, h_ref[...], w_ref, b_ref, o_ref, acc_ref)


def _gcn_layer_gated_kernel(a_ref, h_ref, r_ref, w_ref, b_ref, o_ref, acc_ref,
                            *, gamma):
    gated = h_ref[...] * jnp.exp(-gamma * r_ref[...])  # gate stays in f32
    _gcn_layer_body(a_ref, gated, w_ref, b_ref, o_ref, acc_ref)


def _degree_kernel(a_ref, deg_ref, acc_ref):
    # deg = rowsum(A) + 1 (the +1 is the self-loop of A + I)
    j = pl.program_id(1)

    @pl.when(j == 0)
    def _():
        acc_ref[...] = jnp.full(acc_ref.shape, 1.0, acc_ref.dtype)

    acc_ref[...] += jnp.sum(a_ref[...], axis=1, keepdims=True)

    @pl.when(j == pl.num_programs(1) - 1)
    def _():
        deg_ref[...] = acc_ref[...]


def _norm_scale_kernel(a_ref, degc_ref, degr_ref, o_ref, *, tile):
    # A_hat[i,j] = d_i^-1/2 * (A + I)[i,j] * d_j^-1/2   (no N x N eye materialized)
    i = pl.program_id(0)
    j = pl.program_id(1)
    rowg = i * tile + jax.lax.broadcasted_iota(jnp.int32, (tile, tile), 0)
    colg = j * tile + jax.lax.broadcasted_iota(jnp.int32, (tile, tile), 1)
    a = a_ref[...] + jnp.where(rowg == colg, 1.0, 0.0).astype(jnp.float32)
    dinv_i = jax.lax.rsqrt(degc_ref[...])   # (tile, 1), deg >= 1 always
    dinv_j = jax.lax.rsqrt(degr_ref[...])   # (1, tile)
    o_ref[...] = dinv_i * a * dinv_j


def _gram_kernel(hi_ref, hj_ref, o_ref):
    # A_hat = H @ H^T via dot_general contracting last dims (no transpose copy)
    o_ref[...] = jax.lax.dot_general(
        hi_ref[...].astype(jnp.bfloat16),
        hj_ref[...].astype(jnp.bfloat16),
        (((1,), (1,)), ((), ())),
        preferred_element_type=jnp.float32)


# ----------------------------------------------------------------------------
# pallas_call wrappers
# ----------------------------------------------------------------------------
def fused_linear(x, w, b, *, relu=True):
    m, kdim = x.shape
    k2, n = w.shape
    assert kdim == k2 and b.shape == (1, n)
    tm = _pick_tile(m)
    tk = _pick_tile(kdim)
    grid = (m // tm, kdim // tk)
    cost = pl.CostEstimate(
        flops=2 * m * kdim * n, transcendentals=0,
        bytes_accessed=4 * (m * kdim + kdim * n + m * n))
    return pl.pallas_call(
        functools.partial(_linear_kernel, relu=relu),
        out_shape=jax.ShapeDtypeStruct((m, n), jnp.float32),
        grid=grid,
        in_specs=[
            pl.BlockSpec((tm, tk), lambda i, k: (i, k)),
            pl.BlockSpec((tk, n), lambda i, k: (k, 0)),
            pl.BlockSpec((1, n), lambda i, k: (0, 0)),
        ],
        out_specs=pl.BlockSpec((tm, n), lambda i, k: (i, 0)),
        scratch_shapes=[pltpu.VMEM((tm, n), jnp.float32)],
        compiler_params=pltpu.CompilerParams(
            dimension_semantics=("parallel", "arbitrary"),
            vmem_limit_bytes=_VMEM_LIMIT),
        cost_estimate=cost,
    )(x, w, b)


def gcn_layer_fused(a_prop, h, w, b, *, r=None, gamma=None):
    # One kernel: act( A_prop @ ((H * exp(-gamma*R)) @ W) + b )
    n_pad = a_prop.shape[0]
    k_in = h.shape[1]
    n_out = w.shape[1]
    t = _pick_tile(n_pad)
    grid = (n_pad // t, n_pad // t)

    a_spec = pl.BlockSpec((t, t), lambda i, k: (i, k))
    hr_spec = pl.BlockSpec((t, k_in), lambda i, k: (k, 0))
    w_spec = pl.BlockSpec((k_in, n_out), lambda i, k: (0, 0))
    b_spec = pl.BlockSpec((1, n_out), lambda i, k: (0, 0))
    o_spec = pl.BlockSpec((t, n_out), lambda i, k: (i, 0))

    flops = 2 * n_pad * n_pad * n_out + 2 * n_pad * (n_pad // t) * k_in * n_out
    trans = n_pad * (n_pad // t) * k_in if r is not None else 0
    nbytes = 4 * (n_pad * n_pad + 2 * (n_pad // t) * n_pad * k_in
                  + k_in * n_out + n_pad * n_out)
    cost = pl.CostEstimate(flops=flops, transcendentals=trans,
                           bytes_accessed=nbytes)
    cparams = pltpu.CompilerParams(
        dimension_semantics=("parallel", "arbitrary"),
        vmem_limit_bytes=_VMEM_LIMIT)

    if r is None:
        kernel = _gcn_layer_plain_kernel
        in_specs = [a_spec, hr_spec, w_spec, b_spec]
        args = (a_prop, h, w, b)
    else:
        kernel = functools.partial(_gcn_layer_gated_kernel, gamma=float(gamma))
        in_specs = [a_spec, hr_spec, hr_spec, w_spec, b_spec]
        args = (a_prop, h, r, w, b)

    return pl.pallas_call(
        kernel,
        out_shape=jax.ShapeDtypeStruct((n_pad, n_out), jnp.float32),
        grid=grid,
        in_specs=in_specs,
        out_specs=o_spec,
        scratch_shapes=[pltpu.VMEM((t, n_out), jnp.float32)],
        compiler_params=cparams,
        cost_estimate=cost,
    )(*args)


def gcn_norm(a):
    # Two tiled passes: degree row-sum, then symmetric scaling (f32 throughout).
    n_pad = a.shape[0]
    t = _pick_tile(n_pad)
    grid = (n_pad // t, n_pad // t)

    deg = pl.pallas_call(
        _degree_kernel,
        out_shape=jax.ShapeDtypeStruct((n_pad, 1), jnp.float32),
        grid=grid,
        in_specs=[pl.BlockSpec((t, t), lambda i, j: (i, j))],
        out_specs=pl.BlockSpec((t, 1), lambda i, j: (i, 0)),
        scratch_shapes=[pltpu.VMEM((t, 1), jnp.float32)],
        compiler_params=pltpu.CompilerParams(
            dimension_semantics=("parallel", "arbitrary"),
            vmem_limit_bytes=_VMEM_LIMIT),
    )(a)

    deg_row = deg.reshape(1, n_pad)   # tiny; keeps dinv resident per column tile

    return pl.pallas_call(
        functools.partial(_norm_scale_kernel, tile=t),
        out_shape=jax.ShapeDtypeStruct((n_pad, n_pad), jnp.float32),
        grid=grid,
        in_specs=[pl.BlockSpec((t, t), lambda i, j: (i, j)),
                  pl.BlockSpec((t, 1), lambda i, j: (i, 0)),
                  pl.BlockSpec((1, t), lambda i, j: (0, j))],
        out_specs=pl.BlockSpec((t, t), lambda i, j: (i, j)),
        compiler_params=pltpu.CompilerParams(
            dimension_semantics=("parallel", "parallel"),
            vmem_limit_bytes=_VMEM_LIMIT),
    )(a, deg, deg_row)


def gram(h):
    n_pad, e = h.shape
    t = _pick_tile(n_pad)
    grid = (n_pad // t, n_pad // t)
    cost = pl.CostEstimate(
        flops=2 * n_pad * n_pad * e, transcendentals=0,
        bytes_accessed=4 * (2 * (n_pad // t) * n_pad * e + n_pad * n_pad))
    return pl.pallas_call(
        _gram_kernel,
        out_shape=jax.ShapeDtypeStruct((n_pad, n_pad), jnp.float32),
        grid=grid,
        in_specs=[pl.BlockSpec((t, e), lambda i, j: (i, 0)),
                  pl.BlockSpec((t, e), lambda i, j: (j, 0))],
        out_specs=pl.BlockSpec((t, t), lambda i, j: (i, j)),
        compiler_params=pltpu.CompilerParams(
            dimension_semantics=("parallel", "parallel"),
            vmem_limit_bytes=_VMEM_LIMIT),
        cost_estimate=cost,
    )(h, h)


# ----------------------------------------------------------------------------
# Parameter construction (PyTorch-Linear-style uniform init, zero-padded to
# lane-dense shapes; padding rows/cols are zero so valid outputs are unchanged)
# ----------------------------------------------------------------------------
def init_linear(key, d_in, d_out, d_in_pad, d_out_pad):
    kw, kb = jax.random.split(key)
    bound = 1.0 / math.sqrt(d_in)
    w = jax.random.uniform(kw, (d_in, d_out), jnp.float32, -bound, bound)
    b = jax.random.uniform(kb, (1, d_out), jnp.float32, -bound, bound)
    return _pad2(w, d_in_pad, d_out_pad), _pad2(b, 1, d_out_pad)


def init_mlp(key, n_layers, dims, dims_pad):
    if n_layers <= 0:
        return []
    keys = jax.random.split(key, n_layers)
    return [init_linear(keys[i], dims[i], dims[i + 1], dims_pad[i], dims_pad[i + 1])
            for i in range(n_layers)]


def init_resgcn_params(key, n_nodes, n_features, n_res_layers, n_rep_layers,
                       n_dec_layers, n_res_hidden, n_rep_hidden, n_dec_hidden,
                       embed_dim):
    n_pad = _round_up(n_nodes, LANE)
    pad = lambda d: _round_up(d, LANE)

    k_res, k_fc, k_gcn, k_dec = jax.random.split(key, 4)
    params = {}

    res_dims = [n_nodes] + [n_res_hidden] * max(n_res_layers - 1, 0) + [n_features]
    res_pad = [n_pad] + [pad(d) for d in res_dims[1:]]
    params["res"] = init_mlp(k_res, n_res_layers, res_dims, res_pad)

    fc_layers = n_rep_layers - 1
    fc_dims = [n_features] + [n_rep_hidden] * max(fc_layers - 1, 0) + [n_rep_hidden]
    fc_pad = [pad(d) for d in fc_dims]
    params["rep_fc"] = init_mlp(k_fc, fc_layers, fc_dims, fc_pad)

    gcn_dims = [n_features] + [n_rep_hidden] * max(n_rep_layers - 1, 0) + [embed_dim]
    gcn_pad = [pad(d) for d in gcn_dims]
    gcn_keys = jax.random.split(k_gcn, len(gcn_dims) - 1)
    params["gcn"] = [init_linear(gcn_keys[i], gcn_dims[i], gcn_dims[i + 1],
                                 gcn_pad[i], gcn_pad[i + 1])
                     for i in range(len(gcn_dims) - 1)]

    dec_dims = [embed_dim] + [n_dec_hidden] * max(n_dec_layers - 1, 0) + [n_features]
    dec_pad = [pad(d) for d in dec_dims]
    params["dec"] = init_mlp(k_dec, n_dec_layers, dec_dims, dec_pad)
    return params


# ----------------------------------------------------------------------------
# Forward pass
# ----------------------------------------------------------------------------
def to_dense_adj(edge_index, n_pad):
    # torch_geometric.utils.to_dense_adj (single graph, weight 1 per edge).
    # TODO(synk): sparse scatter-add from edge_index has no clean Pallas TPU
    # equivalent; it is done with an XLA scatter outside the kernels.
    src, dst = edge_index
    a = jnp.zeros((n_pad, n_pad), jnp.float32)
    return a.at[src, dst].add(1.0)


def run_mlp(layers, x):
    h = x
    for w, b in layers:
        h = fused_linear(h, w, b, relu=True)   # act after every Linear (sagod MLP)
    return h


def resgcn_forward(params, x, edge_index, *, gamma, n_rep_layers,
                   n_nodes, n_features):
    n_pad = _round_up(n_nodes, LANE)
    f_pad = params["gcn"][0][0].shape[0]       # padded n_features

    a = to_dense_adj(edge_index, n_pad)        # dense A, [N_pad, N_pad]
    x_p = _pad2(x, n_pad, f_pad)

    # R = res_model(A)
    r = run_mlp(params["res"], a)
    r_l = r

    # D^-1/2 (A + I) D^-1/2 for GCN layers with normalize=True (layers >= 1)
    a_norm = gcn_norm(a)

    # H = rep_gcn[0](x, edge_index)   (normalize=False -> raw A, no self-loops)
    w0, b0 = params["gcn"][0]
    h = gcn_layer_fused(a, x_p, w0, b0)

    for i in range(n_rep_layers - 1):
        w_fc, b_fc = params["rep_fc"][i]
        r_l = fused_linear(r_l, w_fc, b_fc, relu=True)      # rep_fc[2i:2i+2]
        w_g, b_g = params["gcn"][i + 1]
        h = gcn_layer_fused(a_norm, h, w_g, b_g, r=r_l, gamma=gamma)

    x_hat = run_mlp(params["dec"], h)          # [N_pad, F_pad]
    a_hat = gram(h)                            # [N_pad, N_pad]

    return (x_hat[:n_nodes, :n_features],
            a_hat[:n_nodes, :n_nodes],
            r[:n_nodes, :n_features])


# ----------------------------------------------------------------------------
if __name__ == "__main__":
    # Small, module-consistent configuration.
    gamma = 0.5
    n_nodes = 16
    n_features = 8
    n_res_layers = 2
    n_rep_layers = 3
    n_dec_layers = 2
    n_res_hidden = 32
    n_rep_hidden = 32
    n_dec_hidden = 32
    embed_dim = 16

    key = jax.random.PRNGKey(0)
    k_param, k_x = jax.random.split(key)

    params = init_resgcn_params(k_param, n_nodes, n_features, n_res_layers,
                                n_rep_layers, n_dec_layers, n_res_hidden,
                                n_rep_hidden, n_dec_hidden, embed_dim)

    # node features [N, F]
    x = jax.random.normal(k_x, (n_nodes, n_features), jnp.float32)

    # symmetric ring + chords graph, shape [2, E]
    idx = jnp.arange(n_nodes)
    src = jnp.concatenate([idx, (idx + 1) % n_nodes, idx, (idx + 3) % n_nodes])
    dst = jnp.concatenate([(idx + 1) % n_nodes, idx, (idx + 3) % n_nodes, idx])
    edge_index = jnp.stack([src, dst]).astype(jnp.int32)

    fwd = jax.jit(functools.partial(
        resgcn_forward, gamma=gamma, n_rep_layers=n_rep_layers,
        n_nodes=n_nodes, n_features=n_features))

    x_hat, a_hat, r = fwd(params, x, edge_index)
    jax.block_until_ready((x_hat, a_hat, r))

    assert x_hat.shape == (n_nodes, n_features)
    assert a_hat.shape == (n_nodes, n_nodes)
    assert r.shape == (n_nodes, n_features)
    print("KERNEL_OK")
</pallas_src>

<mosaic_0001>
module attributes {stable_mosaic.version = 11 : i64} {
  func.func private @main(%arg0: i32) attributes {dimension_semantics = [#tpu.dimension_semantics<core_parallel>], iteration_bounds = array<i64: 2>, tpu.core_type = #tpu.core_type<sc_scalar_subcore>, window_params = []} {
    return
  }
}

module attributes {stable_mosaic.version = 11 : i64} {
  func.func private @main(%arg0: i32) attributes {dimension_semantics = [#tpu.dimension_semantics<core_parallel>], iteration_bounds = array<i64: 2>, tpu.core_type = #tpu.core_type<sc_scalar_subcore>, window_params = []} {
    return
  }
}

module attributes {stable_mosaic.version = 11 : i64} {
  func.func @_linear_kernel(%arg0: i32, %arg1: i32, %arg2: memref<128x128xf32, #tpu.memory_space<vmem>>, %arg3: memref<128x128xf32, #tpu.memory_space<vmem>>, %arg4: memref<1x128xf32, #tpu.memory_space<vmem>>, %arg5: memref<128x128xf32, #tpu.memory_space<vmem>>, %arg6: memref<128x128xf32, #tpu.memory_space<vmem>>) attributes {dimension_semantics = [#tpu.dimension_semantics<parallel>, #tpu.dimension_semantics<arbitrary>], iteration_bounds = array<i64: 1, 1>, scalar_prefetch = 0 : i64, scratch_operands = 1 : i64, tpu.core_type = #tpu.core_type<tc>, window_params = [{transform_indices = @transform_0, window_bounds = array<i64: 128, 128>}, {transform_indices = @transform_1, window_bounds = array<i64: 128, 128>}, {pipeline_mode = #tpu.pipeline_mode<synchronous>, transform_indices = @transform_2, window_bounds = array<i64: 1, 128>}, {transform_indices = @transform_3, window_bounds = array<i64: 128, 128>}]} {
    %c0_i32 = arith.constant 0 : i32
    %0 = arith.cmpi eq, %arg1, %c0_i32 : i32
    %1 = arith.extui %0 : i1 to i32
    %c0_i32_0 = arith.constant 0 : i32
    %2 = arith.cmpi ne, %1, %c0_i32_0 : i32
    scf.if %2 {
      %cst_10 = arith.constant 0.000000e+00 : f32
      %14 = vector.broadcast %cst_10 : f32 to vector<128x128xf32>
      %c0_11 = arith.constant 0 : index
      %c0_12 = arith.constant 0 : index
      %15 = vector.load %arg6[%c0_11, %c0_12] : memref<128x128xf32, #tpu.memory_space<vmem>>, vector<128x128xf32>
      tpu.vector_store %arg6[%c0_11, %c0_12], %14 {strides = array<i32>} : memref<128x128xf32, #tpu.memory_space<vmem>>, vector<128x128xf32>,
    } else {
    }
    %c0 = arith.constant 0 : index
    %c0_1 = arith.constant 0 : index
    %3 = vector.load %arg6[%c0, %c0_1] : memref<128x128xf32, #tpu.memory_space<vmem>>, vector<128x128xf32>
    %c0_2 = arith.constant 0 : index
    %c0_3 = arith.constant 0 : index
    %4 = vector.load %arg2[%c0_2, %c0_3] : memref<128x128xf32, #tpu.memory_space<vmem>>, vector<128x128xf32>
    %5 = arith.truncf %4 : vector<128x128xf32> to vector<128x128xbf16>
    %c0_4 = arith.constant 0 : index
    %c0_5 = arith.constant 0 : index
    %6 = vector.load %arg3[%c0_4, %c0_5] : memref<128x128xf32, #tpu.memory_space<vmem>>, vector<128x128xf32>
    %7 = arith.truncf %6 : vector<128x128xf32> to vector<128x128xbf16>
    %cst = arith.constant dense<0.000000e+00> : vector<128x128xf32>
    %8 = tpu.matmul %5, %7, %cst {dimension_numbers = #tpu.dot_dimension_numbers<[1], [0], [0], [1], [0, 0, 1, 1], [], []>} : vector<128x128xbf16>, vector<128x128xbf16>, vector<128x128xf32> -> vector<128x128xf32>
    %9 = arith.addf %3, %8 : vector<128x128xf32>
    %c0_6 = arith.constant 0 : index
    %c0_7 = arith.constant 0 : index
    %10 = vector.load %arg6[%c0_6, %c0_7] : memref<128x128xf32, #tpu.memory_space<vmem>>, vector<128x128xf32>
    tpu.vector_store %arg6[%c0_6, %c0_7], %9 {strides = array<i32>} : memref<128x128xf32, #tpu.memory_space<vmem>>, vector<128x128xf32>,
    %c0_i32_8 = arith.constant 0 : i32
    %11 = arith.cmpi eq, %arg1, %c0_i32_8 : i32
    %12 = arith.extui %11 : i1 to i32
    %c0_i32_9 = arith.constant 0 : i32
    %13 = arith.cmpi ne, %12, %c0_i32_9 : i32
    scf.if %13 {
      %c0_10 = arith.constant 0 : index
      %c0_11 = arith.constant 0 : index
      %14 = vector.load %arg6[%c0_10, %c0_11] : memref<128x128xf32, #tpu.memory_space<vmem>>, vector<128x128xf32>
      %c0_12 = arith.constant 0 : index
      %c0_13 = arith.constant 0 : index
      %15 = vector.load %arg4[%c0_12, %c0_13] : memref<1x128xf32, #tpu.memory_space<vmem>>, vector<1x128xf32>
      %16 = vector.broadcast %15 : vector<1x128xf32> to vector<128x128xf32>
      %17 = arith.addf %14, %16 : vector<128x128xf32>
      %cst_14 = arith.constant 0.000000e+00 : f32
      %18 = vector.broadcast %cst_14 : f32 to vector<128x128xf32>
      %19 = arith.maximumf %17, %18 : vector<128x128xf32>
      %c0_15 = arith.constant 0 : index
      %c0_16 = arith.constant 0 : index
      %20 = vector.load %arg5[%c0_15, %c0_16] : memref<128x128xf32, #tpu.memory_space<vmem>>, vector<128x128xf32>
      tpu.vector_store %arg5[%c0_15, %c0_16], %19 {strides = array<i32>} : memref<128x128xf32, #tpu.memory_space<vmem>>, vector<128x128xf32>,
    } else {
    }
    return
  }
  func.func @transform_0(%arg0: i32, %arg1: i32) -> (i32, i32) {
    %c0_i32 = arith.constant 0 : i32
    return %arg0, %arg1 : i32, i32
  }
  func.func @transform_1(%arg0: i32, %arg1: i32) -> (i32, i32) {
    %c0_i32 = arith.constant 0 : i32
    %c0_i32_0 = arith.constant 0 : i32
    return %arg1, %c0_i32 : i32, i32
  }
  func.func @transform_2(%arg0: i32, %arg1: i32) -> (i32, i32) {
    %c0_i32 = arith.constant 0 : i32
    %c0_i32_0 = arith.constant 0 : i32
    %c0_i32_1 = arith.constant 0 : i32
    return %c0_i32, %c0_i32_0 : i32, i32
  }
  func.func @transform_3(%arg0: i32, %arg1: i32) -> (i32, i32) {
    %c0_i32 = arith.constant 0 : i32
    %c0_i32_0 = arith.constant 0 : i32
    return %arg0, %c0_i32 : i32, i32
  }
}

module attributes {stable_mosaic.version = 11 : i64} {
  func.func @_linear_kernel(%arg0: i32, %arg1: i32, %arg2: memref<128x128xf32, #tpu.memory_space<vmem>>, %arg3: memref<128x128xf32, #tpu.memory_space<vmem>>, %arg4: memref<1x128xf32, #tpu.memory_space<vmem>>, %arg5: memref<128x128xf32, #tpu.memory_space<vmem>>, %arg6: memref<128x128xf32, #tpu.memory_space<vmem>>) attributes {dimension_semantics = [#tpu.dimension_semantics<parallel>, #tpu.dimension_semantics<arbitrary>], iteration_bounds = array<i64: 1, 1>, scalar_prefetch = 0 : i64, scratch_operands = 1 : i64, tpu.core_type = #tpu.core_type<tc>, window_params = [{transform_indices = @transform_0, window_bounds = array<i64: 128, 128>}, {transform_indices = @transform_1, window_bounds = array<i64: 128, 128>}, {pipeline_mode = #tpu.pipeline_mode<synchronous>, transform_indices = @transform_2, window_bounds = array<i64: 1, 128>}, {transform_indices = @transform_3, window_bounds = array<i64: 128, 128>}]} {
    %c0_i32 = arith.constant 0 : i32
    %0 = arith.cmpi eq, %arg1, %c0_i32 : i32
    %1 = arith.extui %0 : i1 to i32
    %c0_i32_0 = arith.constant 0 : i32
    %2 = arith.cmpi ne, %1, %c0_i32_0 : i32
    scf.if %2 {
      %cst_10 = arith.constant 0.000000e+00 : f32
      %14 = vector.broadcast %cst_10 : f32 to vector<128x128xf32>
      %c0_11 = arith.constant 0 : index
      %c0_12 = arith.constant 0 : index
      %15 = vector.load %arg6[%c0_11, %c0_12] : memref<128x128xf32, #tpu.memory_space<vmem>>, vector<128x128xf32>
      tpu.vector_store %arg6[%c0_11, %c0_12], %14 {strides = array<i32>} : memref<128x128xf32, #tpu.memory_space<vmem>>, vector<128x128xf32>,
    } else {
    }
    %c0 = arith.constant 0 : index
    %c0_1 = arith.constant 0 : index
    %3 = vector.load %arg6[%c0, %c0_1] : memref<128x128xf32, #tpu.memory_space<vmem>>, vector<128x128xf32>
    %c0_2 = arith.constant 0 : index
    %c0_3 = arith.constant 0 : index
    %4 = vector.load %arg2[%c0_2, %c0_3] : memref<128x128xf32, #tpu.memory_space<vmem>>, vector<128x128xf32>
    %5 = arith.truncf %4 : vector<128x128xf32> to vector<128x128xbf16>
    %c0_4 = arith.constant 0 : index
    %c0_5 = arith.constant 0 : index
    %6 = vector.load %arg3[%c0_4, %c0_5] : memref<128x128xf32, #tpu.memory_space<vmem>>, vector<128x128xf32>
    %7 = arith.truncf %6 : vector<128x128xf32> to vector<128x128xbf16>
    %cst = arith.constant dense<0.000000e+00> : vector<128x128xf32>
    %8 = tpu.matmul %5, %7, %cst {dimension_numbers = #tpu.dot_dimension_numbers<[1], [0], [0], [1], [0, 0, 1, 1], [], []>} : vector<128x128xbf16>, vector<128x128xbf16>, vector<128x128xf32> -> vector<128x128xf32>
    %9 = arith.addf %3, %8 : vector<128x128xf32>
    %c0_6 = arith.constant 0 : index
    %c0_7 = arith.constant 0 : index
    %10 = vector.load %arg6[%c0_6, %c0_7] : memref<128x128xf32, #tpu.memory_space<vmem>>, vector<128x128xf32>
    tpu.vector_store %arg6[%c0_6, %c0_7], %9 {strides = array<i32>} : memref<128x128xf32, #tpu.memory_space<vmem>>, vector<128x128xf32>,
    %c0_i32_8 = arith.constant 0 : i32
    %11 = arith.cmpi eq, %arg1, %c0_i32_8 : i32
    %12 = arith.extui %11 : i1 to i32
    %c0_i32_9 = arith.constant 0 : i32
    %13 = arith.cmpi ne, %12, %c0_i32_9 : i32
    scf.if %13 {
      %c0_10 = arith.constant 0 : index
      %c0_11 = arith.constant 0 : index
      %14 = vector.load %arg6[%c0_10, %c0_11] : memref<128x128xf32, #tpu.memory_space<vmem>>, vector<128x128xf32>
      %c0_12 = arith.constant 0 : index
      %c0_13 = arith.constant 0 : index
      %15 = vector.load %arg4[%c0_12, %c0_13] : memref<1x128xf32, #tpu.memory_space<vmem>>, vector<1x128xf32>
      %16 = vector.broadcast %15 : vector<1x128xf32> to vector<128x128xf32>
      %17 = arith.addf %14, %16 : vector<128x128xf32>
      %cst_14 = arith.constant 0.000000e+00 : f32
      %18 = vector.broadcast %cst_14 : f32 to vector<128x128xf32>
      %19 = arith.maximumf %17, %18 : vector<128x128xf32>
      %c0_15 = arith.constant 0 : index
      %c0_16 = arith.constant 0 : index
      %20 = vector.load %arg5[%c0_15, %c0_16] : memref<128x128xf32, #tpu.memory_space<vmem>>, vector<128x128xf32>
      tpu.vector_store %arg5[%c0_15, %c0_16], %19 {strides = array<i32>} : memref<128x128xf32, #tpu.memory_space<vmem>>, vector<128x128xf32>,
    } else {
    }
    return
  }
  func.func @transform_0(%arg0: i32, %arg1: i32) -> (i32, i32) {
    %c0_i32 = arith.constant 0 : i32
    return %arg0, %arg1 : i32, i32
  }
  func.func @transform_1(%arg0: i32, %arg1: i32) -> (i32, i32) {
    %c0_i32 = arith.constant 0 : i32
    %c0_i32_0 = arith.constant 0 : i32
    return %arg1, %c0_i32 : i32, i32
  }
  func.func @transform_2(%arg0: i32, %arg1: i32) -> (i32, i32) {
    %c0_i32 = arith.constant 0 : i32
    %c0_i32_0 = arith.constant 0 : i32
    %c0_i32_1 = arith.constant 0 : i32
    return %c0_i32, %c0_i32_0 : i32, i32
  }
  func.func @transform_3(%arg0: i32, %arg1: i32) -> (i32, i32) {
    %c0_i32 = arith.constant 0 : i32
    %c0_i32_0 = arith.constant 0 : i32
    return %arg0, %c0_i32 : i32, i32
  }
}

module attributes {stable_mosaic.version = 11 : i64} {
  func.func @_gcn_layer_gated_kernel(%arg0: i32, %arg1: i32, %arg2: memref<128x128xf32, #tpu.memory_space<vmem>>, %arg3: memref<128x128xf32, #tpu.memory_space<vmem>>, %arg4: memref<128x128xf32, #tpu.memory_space<vmem>>, %arg5: memref<128x128xf32, #tpu.memory_space<vmem>>, %arg6: memref<1x128xf32, #tpu.memory_space<vmem>>, %arg7: memref<128x128xf32, #tpu.memory_space<vmem>>, %arg8: memref<128x128xf32, #tpu.memory_space<vmem>>) attributes {dimension_semantics = [#tpu.dimension_semantics<parallel>, #tpu.dimension_semantics<arbitrary>], iteration_bounds = array<i64: 1, 1>, scalar_prefetch = 0 : i64, scratch_operands = 1 : i64, tpu.core_type = #tpu.core_type<tc>, window_params = [{transform_indices = @transform_0, window_bounds = array<i64: 128, 128>}, {transform_indices = @transform_1, window_bounds = array<i64: 128, 128>}, {transform_indices = @transform_2, window_bounds = array<i64: 128, 128>}, {pipeline_mode = #tpu.pipeline_mode<synchronous>, transform_indices = @transform_3, window_bounds = array<i64: 128, 128>}, {pipeline_mode = #tpu.pipeline_mode<synchronous>, transform_indices = @transform_4, window_bounds = array<i64: 1, 128>}, {transform_indices = @transform_5, window_bounds = array<i64: 128, 128>}]} {
    %c0 = arith.constant 0 : index
    %c0_0 = arith.constant 0 : index
    %0 = vector.load %arg3[%c0, %c0_0] : memref<128x128xf32, #tpu.memory_space<vmem>>, vector<128x128xf32>
    %c0_1 = arith.constant 0 : index
    %c0_2 = arith.constant 0 : index
    %1 = vector.load %arg4[%c0_1, %c0_2] : memref<128x128xf32, #tpu.memory_space<vmem>>, vector<128x128xf32>
    %cst = arith.constant -5.000000e-01 : f32
    %2 = vector.broadcast %cst : f32 to vector<128x128xf32>
    %3 = arith.mulf %2, %1 : vector<128x128xf32>
    %4 = math.exp %3 : vector<128x128xf32>
    %5 = arith.mulf %0, %4 : vector<128x128xf32>
    %c0_i32 = arith.constant 0 : i32
    %6 = arith.cmpi eq, %arg1, %c0_i32 : i32
    %7 = arith.extui %6 : i1 to i32
    %c0_i32_3 = arith.constant 0 : i32
    %8 = arith.cmpi ne, %7, %c0_i32_3 : i32
    scf.if %8 {
      %cst_16 = arith.constant 0.000000e+00 : f32
      %23 = vector.broadcast %cst_16 : f32 to vector<128x128xf32>
      %c0_17 = arith.constant 0 : index
      %c0_18 = arith.constant 0 : index
      %24 = vector.load %arg8[%c0_17, %c0_18] : memref<128x128xf32, #tpu.memory_space<vmem>>, vector<128x128xf32>
      tpu.vector_store %arg8[%c0_17, %c0_18], %23 {strides = array<i32>} : memref<128x128xf32, #tpu.memory_space<vmem>>, vector<128x128xf32>,
    } else {
    }
    %9 = arith.truncf %5 : vector<128x128xf32> to vector<128x128xbf16>
    %c0_4 = arith.constant 0 : index
    %c0_5 = arith.constant 0 : index
    %10 = vector.load %arg5[%c0_4, %c0_5] : memref<128x128xf32, #tpu.memory_space<vmem>>, vector<128x128xf32>
    %11 = arith.truncf %10 : vector<128x128xf32> to vector<128x128xbf16>
    %cst_6 = arith.constant dense<0.000000e+00> : vector<128x128xf32>
    %12 = tpu.matmul %9, %11, %cst_6 {dimension_numbers = #tpu.dot_dimension_numbers<[1], [0], [0], [1], [0, 0, 1, 1], [], []>} : vector<128x128xbf16>, vector<128x128xbf16>, vector<128x128xf32> -> vector<128x128xf32>
    %c0_7 = arith.constant 0 : index
    %c0_8 = arith.constant 0 : index
    %13 = vector.load %arg8[%c0_7, %c0_8] : memref<128x128xf32, #tpu.memory_space<vmem>>, vector<128x128xf32>
    %c0_9 = arith.constant 0 : index
    %c0_10 = arith.constant 0 : index
    %14 = vector.load %arg2[%c0_9, %c0_10] : memref<128x128xf32, #tpu.memory_space<vmem>>, vector<128x128xf32>
    %15 = arith.truncf %14 : vector<128x128xf32> to vector<128x128xbf16>
    %16 = arith.truncf %12 : vector<128x128xf32> to vector<128x128xbf16>
    %cst_11 = arith.constant dense<0.000000e+00> : vector<128x128xf32>
    %17 = tpu.matmul %15, %16, %cst_11 {dimension_numbers = #tpu.dot_dimension_numbers<[1], [0], [0], [1], [0, 0, 1, 1], [], []>} : vector<128x128xbf16>, vector<128x128xbf16>, vector<128x128xf32> -> vector<128x128xf32>
    %18 = arith.addf %13, %17 : vector<128x128xf32>
    %c0_12 = arith.constant 0 : index
    %c0_13 = arith.constant 0 : index
    %19 = vector.load %arg8[%c0_12, %c0_13] : memref<128x128xf32, #tpu.memory_space<vmem>>, vector<128x128xf32>
    tpu.vector_store %arg8[%c0_12, %c0_13], %18 {strides = array<i32>} : memref<128x128xf32, #tpu.memory_space<vmem>>, vector<128x128xf32>,
    %c0_i32_14 = arith.constant 0 : i32
    %20 = arith.cmpi eq, %arg1, %c0_i32_14 : i32
    %21 = arith.extui %20 : i1 to i32
    %c0_i32_15 = arith.constant 0 : i32
    %22 = arith.cmpi ne, %21, %c0_i32_15 : i32
    scf.if %22 {
      %c0_16 = arith.constant 0 : index
      %c0_17 = arith.constant 0 : index
      %23 = vector.load %arg8[%c0_16, %c0_17] : memref<128x128xf32, #tpu.memory_space<vmem>>, vector<128x128xf32>
      %c0_18 = arith.constant 0 : index
      %c0_19 = arith.constant 0 : index
      %24 = vector.load %arg6[%c0_18, %c0_19] : memref<1x128xf32, #tpu.memory_space<vmem>>, vector<1x128xf32>
      %25 = vector.broadcast %24 : vector<1x128xf32> to vector<128x128xf32>
      %26 = arith.addf %23, %25 : vector<128x128xf32>
      %cst_20 = arith.constant 0.000000e+00 : f32
      %27 = vector.broadcast %cst_20 : f32 to vector<128x128xf32>
      %28 = arith.maximumf %26, %27 : vector<128x128xf32>
      %c0_21 = arith.constant 0 : index
      %c0_22 = arith.constant 0 : index
      %29 = vector.load %arg7[%c0_21, %c0_22] : memref<128x128xf32, #tpu.memory_space<vmem>>, vector<128x128xf32>
      tpu.vector_store %arg7[%c0_21, %c0_22], %28 {strides = array<i32>} : memref<128x128xf32, #tpu.memory_space<vmem>>, vector<128x128xf32>,
    } else {
    }
    return
  }
  func.func @transform_0(%arg0: i32, %arg1: i32) -> (i32, i32) {
    %c0_i32 = arith.constant 0 : i32
    return %arg0, %arg1 : i32, i32
  }
  func.func @transform_1(%arg0: i32, %arg1: i32) -> (i32, i32) {
    %c0_i32 = arith.constant 0 : i32
    %c0_i32_0 = arith.constant 0 : i32
    return %arg1, %c0_i32 : i32, i32
  }
  func.func @transform_2(%arg0: i32, %arg1: i32) -> (i32, i32) {
    %c0_i32 = arith.constant 0 : i32
    %c0_i32_0 = arith.constant 0 : i32
    return %arg1, %c0_i32 : i32, i32
  }
  func.func @transform_3(%arg0: i32, %arg1: i32) -> (i32, i32) {
    %c0_i32 = arith.constant 0 : i32
    %c0_i32_0 = arith.constant 0 : i32
    %c0_i32_1 = arith.constant 0 : i32
    return %c0_i32, %c0_i32_0 : i32, i32
  }
  func.func @transform_4(%arg0: i32, %arg1: i32) -> (i32, i32) {
    %c0_i32 = arith.constant 0 : i32
    %c0_i32_0 = arith.constant 0 : i32
    %c0_i32_1 = arith.constant 0 : i32
    return %c0_i32, %c0_i32_0 : i32, i32
  }
  func.func @transform_5(%arg0: i32, %arg1: i32) -> (i32, i32) {
    %c0_i32 = arith.constant 0 : i32
    %c0_i32_0 = arith.constant 0 : i32
    return %arg0, %c0_i32 : i32, i32
  }
}

module attributes {stable_mosaic.version = 11 : i64} {
  func.func @_gcn_layer_plain_kernel(%arg0: i32, %arg1: i32, %arg2: memref<128x128xf32, #tpu.memory_space<vmem>>, %arg3: memref<128x128xf32, #tpu.memory_space<vmem>>, %arg4: memref<128x128xf32, #tpu.memory_space<vmem>>, %arg5: memref<1x128xf32, #tpu.memory_space<vmem>>, %arg6: memref<128x128xf32, #tpu.memory_space<vmem>>, %arg7: memref<128x128xf32, #tpu.memory_space<vmem>>) attributes {dimension_semantics = [#tpu.dimension_semantics<parallel>, #tpu.dimension_semantics<arbitrary>], iteration_bounds = array<i64: 1, 1>, scalar_prefetch = 0 : i64, scratch_operands = 1 : i64, tpu.core_type = #tpu.core_type<tc>, window_params = [{transform_indices = @transform_0, window_bounds = array<i64: 128, 128>}, {transform_indices = @transform_1, window_bounds = array<i64: 128, 128>}, {pipeline_mode = #tpu.pipeline_mode<synchronous>, transform_indices = @transform_2, window_bounds = array<i64: 128, 128>}, {pipeline_mode = #tpu.pipeline_mode<synchronous>, transform_indices = @transform_3, window_bounds = array<i64: 1, 128>}, {transform_indices = @transform_4, window_bounds = array<i64: 128, 128>}]} {
    %c0 = arith.constant 0 : index
    %c0_0 = arith.constant 0 : index
    %0 = vector.load %arg3[%c0, %c0_0] : memref<128x128xf32, #tpu.memory_space<vmem>>, vector<128x128xf32>
    %c0_i32 = arith.constant 0 : i32
    %1 = arith.cmpi eq, %arg1, %c0_i32 : i32
    %2 = arith.extui %1 : i1 to i32
    %c0_i32_1 = arith.constant 0 : i32
    %3 = arith.cmpi ne, %2, %c0_i32_1 : i32
    scf.if %3 {
      %cst_13 = arith.constant 0.000000e+00 : f32
      %18 = vector.broadcast %cst_13 : f32 to vector<128x128xf32>
      %c0_14 = arith.constant 0 : index
      %c0_15 = arith.constant 0 : index
      %19 = vector.load %arg7[%c0_14, %c0_15] : memref<128x128xf32, #tpu.memory_space<vmem>>, vector<128x128xf32>
      tpu.vector_store %arg7[%c0_14, %c0_15], %18 {strides = array<i32>} : memref<128x128xf32, #tpu.memory_space<vmem>>, vector<128x128xf32>,
    } else {
    }
    %4 = arith.truncf %0 : vector<128x128xf32> to vector<128x128xbf16>
    %c0_2 = arith.constant 0 : index
    %c0_3 = arith.constant 0 : index
    %5 = vector.load %arg4[%c0_2, %c0_3] : memref<128x128xf32, #tpu.memory_space<vmem>>, vector<128x128xf32>
    %6 = arith.truncf %5 : vector<128x128xf32> to vector<128x128xbf16>
    %cst = arith.constant dense<0.000000e+00> : vector<128x128xf32>
    %7 = tpu.matmul %4, %6, %cst {dimension_numbers = #tpu.dot_dimension_numbers<[1], [0], [0], [1], [0, 0, 1, 1], [], []>} : vector<128x128xbf16>, vector<128x128xbf16>, vector<128x128xf32> -> vector<128x128xf32>
    %c0_4 = arith.constant 0 : index
    %c0_5 = arith.constant 0 : index
    %8 = vector.load %arg7[%c0_4, %c0_5] : memref<128x128xf32, #tpu.memory_space<vmem>>, vector<128x128xf32>
    %c0_6 = arith.constant 0 : index
    %c0_7 = arith.constant 0 : index
    %9 = vector.load %arg2[%c0_6, %c0_7] : memref<128x128xf32, #tpu.memory_space<vmem>>, vector<128x128xf32>
    %10 = arith.truncf %9 : vector<128x128xf32> to vector<128x128xbf16>
    %11 = arith.truncf %7 : vector<128x128xf32> to vector<128x128xbf16>
    %cst_8 = arith.constant dense<0.000000e+00> : vector<128x128xf32>
    %12 = tpu.matmul %10, %11, %cst_8 {dimension_numbers = #tpu.dot_dimension_numbers<[1], [0], [0], [1], [0, 0, 1, 1], [], []>} : vector<128x128xbf16>, vector<128x128xbf16>, vector<128x128xf32> -> vector<128x128xf32>
    %13 = arith.addf %8, %12 : vector<128x128xf32>
    %c0_9 = arith.constant 0 : index
    %c0_10 = arith.constant 0 : index
    %14 = vector.load %arg7[%c0_9, %c0_10] : memref<128x128xf32, #tpu.memory_space<vmem>>, vector<128x128xf32>
    tpu.vector_store %arg7[%c0_9, %c0_10], %13 {strides = array<i32>} : memref<128x128xf32, #tpu.memory_space<vmem>>, vector<128x128xf32>,
    %c0_i32_11 = arith.constant 0 : i32
    %15 = arith.cmpi eq, %arg1, %c0_i32_11 : i32
    %16 = arith.extui %15 : i1 to i32
    %c0_i32_12 = arith.constant 0 : i32
    %17 = arith.cmpi ne, %16, %c0_i32_12 : i32
    scf.if %17 {
      %c0_13 = arith.constant 0 : index
      %c0_14 = arith.constant 0 : index
      %18 = vector.load %arg7[%c0_13, %c0_14] : memref<128x128xf32, #tpu.memory_space<vmem>>, vector<128x128xf32>
      %c0_15 = arith.constant 0 : index
      %c0_16 = arith.constant 0 : index
      %19 = vector.load %arg5[%c0_15, %c0_16] : memref<1x128xf32, #tpu.memory_space<vmem>>, vector<1x128xf32>
      %20 = vector.broadcast %19 : vector<1x128xf32> to vector<128x128xf32>
      %21 = arith.addf %18, %20 : vector<128x128xf32>
      %cst_17 = arith.constant 0.000000e+00 : f32
      %22 = vector.broadcast %cst_17 : f32 to vector<128x128xf32>
      %23 = arith.maximumf %21, %22 : vector<128x128xf32>
      %c0_18 = arith.constant 0 : index
      %c0_19 = arith.constant 0 : index
      %24 = vector.load %arg6[%c0_18, %c0_19] : memref<128x128xf32, #tpu.memory_space<vmem>>, vector<128x128xf32>
      tpu.vector_store %arg6[%c0_18, %c0_19], %23 {strides = array<i32>} : memref<128x128xf32, #tpu.memory_space<vmem>>, vector<128x128xf32>,
    } else {
    }
    return
  }
  func.func @transform_0(%arg0: i32, %arg1: i32) -> (i32, i32) {
    %c0_i32 = arith.constant 0 : i32
    return %arg0, %arg1 : i32, i32
  }
  func.func @transform_1(%arg0: i32, %arg1: i32) -> (i32, i32) {
    %c0_i32 = arith.constant 0 : i32
    %c0_i32_0 = arith.constant 0 : i32
    return %arg1, %c0_i32 : i32, i32
  }
  func.func @transform_2(%arg0: i32, %arg1: i32) -> (i32, i32) {
    %c0_i32 = arith.constant 0 : i32
    %c0_i32_0 = arith.constant 0 : i32
    %c0_i32_1 = arith.constant 0 : i32
    return %c0_i32, %c0_i32_0 : i32, i32
  }
  func.func @transform_3(%arg0: i32, %arg1: i32) -> (i32, i32) {
    %c0_i32 = arith.constant 0 : i32
    %c0_i32_0 = arith.constant 0 : i32
    %c0_i32_1 = arith.constant 0 : i32
    return %c0_i32, %c0_i32_0 : i32, i32
  }
  func.func @transform_4(%arg0: i32, %arg1: i32) -> (i32, i32) {
    %c0_i32 = arith.constant 0 : i32
    %c0_i32_0 = arith.constant 0 : i32
    return %arg0, %c0_i32 : i32, i32
  }
}

module attributes {stable_mosaic.version = 11 : i64} {
  func.func @_degree_kernel(%arg0: i32, %arg1: i32, %arg2: memref<128x128xf32, #tpu.memory_space<vmem>>, %arg3: memref<128x1xf32, #tpu.memory_space<vmem>>, %arg4: memref<128x1xf32, #tpu.memory_space<vmem>>) attributes {dimension_semantics = [#tpu.dimension_semantics<parallel>, #tpu.dimension_semantics<arbitrary>], iteration_bounds = array<i64: 1, 1>, scalar_prefetch = 0 : i64, scratch_operands = 1 : i64, tpu.core_type = #tpu.core_type<tc>, window_params = [{transform_indices = @transform_0, window_bounds = array<i64: 128, 128>}, {transform_indices = @transform_1, window_bounds = array<i64: 128, 1>}]} {
    %c0_i32 = arith.constant 0 : i32
    %0 = arith.cmpi eq, %arg1, %c0_i32 : i32
    %1 = arith.extui %0 : i1 to i32
    %c0_i32_0 = arith.constant 0 : i32
    %2 = arith.cmpi ne, %1, %c0_i32_0 : i32
    scf.if %2 {
      %cst_8 = arith.constant 1.000000e+00 : f32
      %12 = vector.broadcast %cst_8 : f32 to vector<128x1xf32>
      %c0_9 = arith.constant 0 : index
      %c0_10 = arith.constant 0 : index
      %13 = vector.load %arg4[%c0_9, %c0_10] : memref<128x1xf32, #tpu.memory_space<vmem>>, vector<128x1xf32>
      tpu.vector_store %arg4[%c0_9, %c0_10], %12 {strides = array<i32>} : memref<128x1xf32, #tpu.memory_space<vmem>>, vector<128x1xf32>,
    } else {
    }
    %c0 = arith.constant 0 : index
    %c0_1 = arith.constant 0 : index
    %3 = vector.load %arg4[%c0, %c0_1] : memref<128x1xf32, #tpu.memory_space<vmem>>, vector<128x1xf32>
    %c0_2 = arith.constant 0 : index
    %c0_3 = arith.constant 0 : index
    %4 = vector.load %arg2[%c0_2, %c0_3] : memref<128x128xf32, #tpu.memory_space<vmem>>, vector<128x128xf32>
    %cst = arith.constant dense<0.000000e+00> : vector<128xf32>
    %5 = vector.multi_reduction <add>, %4, %cst [1] : vector<128x128xf32> to vector<128xf32>
    %6 = vector.shape_cast %5 : vector<128xf32> to vector<128x1xf32>
    %7 = arith.addf %3, %6 : vector<128x1xf32>
    %c0_4 = arith.constant 0 : index
    %c0_5 = arith.constant 0 : index
    %8 = vector.load %arg4[%c0_4, %c0_5] : memref<128x1xf32, #tpu.memory_space<vmem>>, vector<128x1xf32>
    tpu.vector_store %arg4[%c0_4, %c0_5], %7 {strides = array<i32>} : memref<128x1xf32, #tpu.memory_space<vmem>>, vector<128x1xf32>,
    %c0_i32_6 = arith.constant 0 : i32
    %9 = arith.cmpi eq, %arg1, %c0_i32_6 : i32
    %10 = arith.extui %9 : i1 to i32
    %c0_i32_7 = arith.constant 0 : i32
    %11 = arith.cmpi ne, %10, %c0_i32_7 : i32
    scf.if %11 {
      %c0_8 = arith.constant 0 : index
      %c0_9 = arith.constant 0 : index
      %12 = vector.load %arg4[%c0_8, %c0_9] : memref<128x1xf32, #tpu.memory_space<vmem>>, vector<128x1xf32>
      %c0_10 = arith.constant 0 : index
      %c0_11 = arith.constant 0 : index
      %13 = vector.load %arg3[%c0_10, %c0_11] : memref<128x1xf32, #tpu.memory_space<vmem>>, vector<128x1xf32>
      tpu.vector_store %arg3[%c0_10, %c0_11], %12 {strides = array<i32>} : memref<128x1xf32, #tpu.memory_space<vmem>>, vector<128x1xf32>,
    } else {
    }
    return
  }
  func.func @transform_0(%arg0: i32, %arg1: i32) -> (i32, i32) {
    %c0_i32 = arith.constant 0 : i32
    return %arg0, %arg1 : i32, i32
  }
  func.func @transform_1(%arg0: i32, %arg1: i32) -> (i32, i32) {
    %c0_i32 = arith.constant 0 : i32
    %c0_i32_0 = arith.constant 0 : i32
    return %arg0, %c0_i32 : i32, i32
  }
}

module attributes {stable_mosaic.version = 11 : i64} {
  func.func @_norm_scale_kernel(%arg0: i32, %arg1: i32, %arg2: memref<128x128xf32, #tpu.memory_space<vmem>>, %arg3: memref<128x1xf32, #tpu.memory_space<vmem>>, %arg4: memref<1x128xf32, #tpu.memory_space<vmem>>, %arg5: memref<128x128xf32, #tpu.memory_space<vmem>>) attributes {dimension_semantics = [#tpu.dimension_semantics<parallel>, #tpu.dimension_semantics<parallel>], iteration_bounds = array<i64: 1, 1>, scalar_prefetch = 0 : i64, scratch_operands = 0 : i64, tpu.core_type = #tpu.core_type<tc>, window_params = [{transform_indices = @transform_0, window_bounds = array<i64: 128, 128>}, {transform_indices = @transform_1, window_bounds = array<i64: 128, 1>}, {transform_indices = @transform_2, window_bounds = array<i64: 1, 128>}, {transform_indices = @transform_3, window_bounds = array<i64: 128, 128>}]} {
    %c128_i32 = arith.constant 128 : i32
    %0 = arith.muli %arg0, %c128_i32 : i32
    %1 = tpu.iota {dimensions = array<i32: 0>} : vector<128x128xi32>
    %2 = vector.broadcast %0 : i32 to vector<128x128xi32>
    %3 = arith.addi %2, %1 : vector<128x128xi32>
    %c128_i32_0 = arith.constant 128 : i32
    %4 = arith.muli %arg1, %c128_i32_0 : i32
    %5 = tpu.iota {dimensions = array<i32: 1>} : vector<128x128xi32>
    %6 = vector.broadcast %4 : i32 to vector<128x128xi32>
    %7 = arith.addi %6, %5 : vector<128x128xi32>
    %c0 = arith.constant 0 : index
    %c0_1 = arith.constant 0 : index
    %8 = vector.load %arg2[%c0, %c0_1] : memref<128x128xf32, #tpu.memory_space<vmem>>, vector<128x128xf32>
    %9 = arith.cmpi eq, %3, %7 : vector<128x128xi32>
    %cst = arith.constant 1.000000e+00 : f32
    %cst_2 = arith.constant 0.000000e+00 : f32
    %10 = vector.broadcast %cst : f32 to vector<128x128xf32>
    %11 = vector.broadcast %cst_2 : f32 to vector<128x128xf32>
    %12 = arith.select %9, %10, %11 : vector<128x128xi1>, vector<128x128xf32>
    %13 = arith.addf %8, %12 : vector<128x128xf32>
    %c0_3 = arith.constant 0 : index
    %c0_4 = arith.constant 0 : index
    %14 = vector.load %arg3[%c0_3, %c0_4] : memref<128x1xf32, #tpu.memory_space<vmem>>, vector<128x1xf32>
    %15 = math.rsqrt %14 : vector<128x1xf32>
    %c0_5 = arith.constant 0 : index
    %c0_6 = arith.constant 0 : index
    %16 = vector.load %arg4[%c0_5, %c0_6] : memref<1x128xf32, #tpu.memory_space<vmem>>, vector<1x128xf32>
    %17 = math.rsqrt %16 : vector<1x128xf32>
    %18 = vector.broadcast %15 : vector<128x1xf32> to vector<128x128xf32>
    %19 = arith.mulf %18, %13 : vector<128x128xf32>
    %20 = vector.broadcast %17 : vector<1x128xf32> to vector<128x128xf32>
    %21 = arith.mulf %19, %20 : vector<128x128xf32>
    %c0_7 = arith.constant 0 : index
    %c0_8 = arith.constant 0 : index
    %22 = vector.load %arg5[%c0_7, %c0_8] : memref<128x128xf32, #tpu.memory_space<vmem>>, vector<128x128xf32>
    tpu.vector_store %arg5[%c0_7, %c0_8], %21 {strides = array<i32>} : memref<128x128xf32, #tpu.memory_space<vmem>>, vector<128x128xf32>,
    return
  }
  func.func @transform_0(%arg0: i32, %arg1: i32) -> (i32, i32) {
    %c0_i32 = arith.constant 0 : i32
    return %arg0, %arg1 : i32, i32
  }
  func.func @transform_1(%arg0: i32, %arg1: i32) -> (i32, i32) {
    %c0_i32 = arith.constant 0 : i32
    %c0_i32_0 = arith.constant 0 : i32
    return %arg0, %c0_i32 : i32, i32
  }
  func.func @transform_2(%arg0: i32, %arg1: i32) -> (i32, i32) {
    %c0_i32 = arith.constant 0 : i32
    %c0_i32_0 = arith.constant 0 : i32
    return %c0_i32, %arg1 : i32, i32
  }
  func.func @transform_3(%arg0: i32, %arg1: i32) -> (i32, i32) {
    %c0_i32 = arith.constant 0 : i32
    return %arg0, %arg1 : i32, i32
  }
}

module attributes {stable_mosaic.version = 11 : i64} {
  func.func @_gram_kernel(%arg0: i32, %arg1: i32, %arg2: memref<128x128xf32, #tpu.memory_space<vmem>>, %arg3: memref<128x128xf32, #tpu.memory_space<vmem>>, %arg4: memref<128x128xf32, #tpu.memory_space<vmem>>) attributes {dimension_semantics = [#tpu.dimension_semantics<parallel>, #tpu.dimension_semantics<parallel>], iteration_bounds = array<i64: 1, 1>, scalar_prefetch = 0 : i64, scratch_operands = 0 : i64, tpu.core_type = #tpu.core_type<tc>, window_params = [{transform_indices = @transform_0, window_bounds = array<i64: 128, 128>}, {transform_indices = @transform_1, window_bounds = array<i64: 128, 128>}, {transform_indices = @transform_2, window_bounds = array<i64: 128, 128>}]} {
    %c0 = arith.constant 0 : index
    %c0_0 = arith.constant 0 : index
    %0 = vector.load %arg2[%c0, %c0_0] : memref<128x128xf32, #tpu.memory_space<vmem>>, vector<128x128xf32>
    %1 = arith.truncf %0 : vector<128x128xf32> to vector<128x128xbf16>
    %c0_1 = arith.constant 0 : index
    %c0_2 = arith.constant 0 : index
    %2 = vector.load %arg3[%c0_1, %c0_2] : memref<128x128xf32, #tpu.memory_space<vmem>>, vector<128x128xf32>
    %3 = arith.truncf %2 : vector<128x128xf32> to vector<128x128xbf16>
    %cst = arith.constant dense<0.000000e+00> : vector<128x128xf32>
    %4 = tpu.matmul %1, %3, %cst {dimension_numbers = #tpu.dot_dimension_numbers<[1], [1], [0], [0], [0, 0, 1, 0], [], []>} : vector<128x128xbf16>, vector<128x128xbf16>, vector<128x128xf32> -> vector<128x128xf32>
    %c0_3 = arith.constant 0 : index
    %c0_4 = arith.constant 0 : index
    %5 = vector.load %arg4[%c0_3, %c0_4] : memref<128x128xf32, #tpu.memory_space<vmem>>, vector<128x128xf32>
    tpu.vector_store %arg4[%c0_3, %c0_4], %4 {strides = array<i32>} : memref<128x128xf32, #tpu.memory_space<vmem>>, vector<128x128xf32>,
    return
  }
  func.func @transform_0(%arg0: i32, %arg1: i32) -> (i32, i32) {
    %c0_i32 = arith.constant 0 : i32
    %c0_i32_0 = arith.constant 0 : i32
    return %arg0, %c0_i32 : i32, i32
  }
  func.func @transform_1(%arg0: i32, %arg1: i32) -> (i32, i32) {
    %c0_i32 = arith.constant 0 : i32
    %c0_i32_0 = arith.constant 0 : i32
    return %arg1, %c0_i32 : i32, i32
  }
  func.func @transform_2(%arg0: i32, %arg1: i32) -> (i32, i32) {
    %c0_i32 = arith.constant 0 : i32
    return %arg0, %arg1 : i32, i32
  }
}

</mosaic_0001>

<bundles_post_ra>
// kernel: resgcn_forward.13
= control target key start
LH: loop header
LB: loop body
LE: loop exit
PB: predicated region body
PF: predicated region fallthrough
CT: control target
= control target key end

     0   :  { %s538_s1 = inlined_call_operand.vmem [shape: f32[128,128], index: 1, kind: input, shape index: {}]   ;;  %s539_s0 = inlined_call_operand.vmem [shape: f32[128,128], index: 0, kind: input, shape index: {}]   ;;  %s540_s2 = inlined_call_operand.vmem [shape: f32[1,128], index: 2, kind: input, shape index: {}]   ;;  %s541_s3 = inlined_call_operand.vmem [shape: f32[128,128], index: 3, kind: output, shape index: {}]  }
   0x1   :  { %v89_v0 = vld [vmem:[%s538_s1 + $0x70] sm:$0xff]  ;;  %v90_v1 = vld [vmem:[%s538_s1 + $0x78] sm:$0xff]  ;;  %v87_v2 = vld [vmem:[%s538_s1 + $0x60] sm:$0xff] }
   0x2   :  { %v98_v3 = vpack.c.bf16 %v90_v1, %v89_v0  ;;  %v88_v4 = vld [vmem:[%s538_s1 + $0x68] sm:$0xff]  ;;  %v85_v6 = vld [vmem:[%s538_s1 + $0x50] sm:$0xff]  ;;  %v86_v7 = vld [vmem:[%s538_s1 + $0x58] sm:$0xff] }
   0x3   :  { %v97_v5 = vpack.c.bf16 %v88_v4, %v87_v2  ;;  %v96_v8 = vpack.c.bf16 %v86_v7, %v85_v6  ;;  %v83_v9 = vld [vmem:[%s538_s1 + $0x40] sm:$0xff]  ;;  %v52_v11 = vld [vmem:[%s539_s0 + $0x8] sm:$0xff]  ;;  %v81_v18 = vld [vmem:[%s538_s1 + $0x30] sm:$0xff] }
   0x4   :  { %323 = vmatprep.subr.bf16.mxu0 %v98_v3  ;;  %355 = vmatprep.subr.bf16.mxu1 %v98_v3  ;;  %v51_v10 = vld [vmem:[%s539_s0] sm:$0xff]  ;;  %v84_v12 = vld [vmem:[%s538_s1 + $0x48] sm:$0xff]  ;;  %v82_v19 = vld [vmem:[%s538_s1 + $0x38] sm:$0xff] }
   0x5   :  { %324 = vmatpush3.bf16.msra.mxu0 %v98_v3  ;;  %363 = vmatpush3.bf16.msra.mxu1 %v98_v3  ;;  %v67_v13 = vpack.c.bf16 %v52_v11, %v51_v10  ;;  %v59_v14 = vld [vmem:[%s539_s0 + $0x40] sm:$0xff]  ;;  %v60_v15 = vld [vmem:[%s539_s0 + $0x48] sm:$0xff]  ;;  %v95_v17 = vpack.c.bf16 %v84_v12, %v83_v9  ;;  %v94_v20 = vpack.c.bf16 %v82_v19, %v81_v18  ;;  %v77_v24 = vld [vmem:[%s538_s1 + $0x10] sm:$0xff] }
   0x6   :  { %325 = vmatprep.subr.bf16.mxu0 %v97_v5  ;;  %356 = vmatprep.subr.bf16.mxu1 %v97_v5  ;;  %v71_v16 = vpack.c.bf16 %v60_v15, %v59_v14  ;;  %v79_v21 = vld [vmem:[%s538_s1 + $0x20] sm:$0xff]  ;;  %v80_v22 = vld [vmem:[%s538_s1 + $0x28] sm:$0xff]  ;;  %v78_v25 = vld [vmem:[%s538_s1 + $0x18] sm:$0xff] }
   0x7   :  { %339 = vmatprep.mubr.bf16.mxu0 %v67_v13  ;;  %v93_v23 = vpack.c.bf16 %v80_v22, %v79_v21  ;;  %v92_v26 = vpack.c.bf16 %v78_v25, %v77_v24  ;;  %v75_v27 = vld [vmem:[%s538_s1] sm:$0xff]  ;;  %v76_v28 = vld [vmem:[%s538_s1 + $0x8] sm:$0xff]  ;;  %v53_v30 = vld [vmem:[%s539_s0 + $0x10] sm:$0xff] }
   0x8   :  { %347 = vmatprep.mubr.bf16.mxu1 %v71_v16  ;;  %v91_v29 = vpack.c.bf16 %v76_v28, %v75_v27  ;;  %v54_v31 = vld [vmem:[%s539_s0 + $0x18] sm:$0xff]  ;;  %v61_v32 = vld [vmem:[%s539_s0 + $0x50] sm:$0xff]  ;;  %v55_v34 = vld [vmem:[%s539_s0 + $0x20] sm:$0xff] }
   0x9   :  { %326 = vmatpush3.bf16.msra.mxu0 %v97_v5  ;;  %364 = vmatpush3.bf16.msra.mxu1 %v97_v5  ;;  %v62_v33 = vld [vmem:[%s539_s0 + $0x58] sm:$0xff]  ;;  %v56_v35 = vld [vmem:[%s539_s0 + $0x28] sm:$0xff]  ;;  %v63_v36 = vld [vmem:[%s539_s0 + $0x60] sm:$0xff]  ;;  %v68_v38 = vpack.c.bf16 %v54_v31, %v53_v30 }
   0xa   :  { %327 = vmatprep.subr.bf16.mxu0 %v96_v8  ;;  %357 = vmatprep.subr.bf16.mxu1 %v96_v8  ;;  %v64_v37 = vld [vmem:[%s539_s0 + $0x68] sm:$0xff]  ;;  %v72_v39 = vpack.c.bf16 %v62_v33, %v61_v32  ;;  %v69_v40 = vpack.c.bf16 %v56_v35, %v55_v34  ;;  %v57_v42 = vld [vmem:[%s539_s0 + $0x30] sm:$0xff]  ;;  %v58_v43 = vld [vmem:[%s539_s0 + $0x38] sm:$0xff] }
   0xb   :  { %v73_v41 = vpack.c.bf16 %v64_v37, %v63_v36  ;;  %v65_v44 = vld [vmem:[%s539_s0 + $0x70] sm:$0xff]  ;;  %v66_v45 = vld [vmem:[%s539_s0 + $0x78] sm:$0xff]  ;;  %v70_v46 = vpack.c.bf16 %v58_v43, %v57_v42  ;;  %v306_v48 = vld [vmem:[%s540_s2] ss:$0 sm:$0xff] }
   0xc   :  { %v74_v47 = vpack.c.bf16 %v66_v45, %v65_v44 }
   0xd   :  { %328 = vmatpush3.bf16.msra.mxu0 %v96_v8  ;;  %365 = vmatpush3.bf16.msra.mxu1 %v96_v8 }
   0xe   :  { %329 = vmatprep.subr.bf16.mxu0 %v95_v17  ;;  %358 = vmatprep.subr.bf16.mxu1 %v95_v17 }
  0x11   :  { %330 = vmatpush3.bf16.msra.mxu0 %v95_v17  ;;  %366 = vmatpush3.bf16.msra.mxu1 %v95_v17 }
  0x12   :  { %331 = vmatprep.subr.bf16.mxu0 %v94_v20  ;;  %359 = vmatprep.subr.bf16.mxu1 %v94_v20 }
  0x15   :  { %332 = vmatpush3.bf16.msra.mxu0 %v94_v20  ;;  %367 = vmatpush3.bf16.msra.mxu1 %v94_v20 }
  0x16   :  { %333 = vmatprep.subr.bf16.mxu0 %v93_v23  ;;  %360 = vmatprep.subr.bf16.mxu1 %v93_v23 }
  0x19   :  { %334 = vmatpush3.bf16.msra.mxu0 %v93_v23  ;;  %368 = vmatpush3.bf16.msra.mxu1 %v93_v23 }
  0x1a   :  { %335 = vmatprep.subr.bf16.mxu0 %v92_v26  ;;  %361 = vmatprep.subr.bf16.mxu1 %v92_v26 }
  0x1d   :  { %336 = vmatpush3.bf16.msra.mxu0 %v92_v26  ;;  %369 = vmatpush3.bf16.msra.mxu1 %v92_v26 }
  0x1e   :  { %337 = vmatprep.subr.bf16.mxu0 %v91_v29  ;;  %362 = vmatprep.subr.bf16.mxu1 %v91_v29 }
  0x21   :  { %338 = vmatpush3.bf16.msra.mxu0 %v91_v29  ;;  %370 = vmatpush3.bf16.msra.mxu1 %v91_v29 }
  0x24   :  { %340 = vmatmul.mubr.bf16.vlgmr.msra.gmra.mxu0 %v68_v38  ;;  %348 = vmatmul.mubr.bf16.vlgmr.msra.gmra.mxu1 %v72_v39 }
  0x25   :  { %343 = vmatprep.mubr.bf16.mxu0 %v69_v40  ;;  %351 = vmatprep.mubr.bf16.mxu1 %v73_v41 }
  0x2c   :  { %344 = vmatmul.mubr.bf16.gmra.mxu0 %v70_v46  ;;  %352 = vmatmul.mubr.bf16.gmra.mxu1 %v74_v47 }
  0xe4   :  { %v341_v49 = vpop.f32.mrf.mxu0  ;;  %v349_v50 = vpop.f32.mrf.mxu1 }
  0xe5   :  { %v256_v51 = vadd.f32 %v341_v49, %v306_v48  ;;  %v264_v52 = vadd.f32 %v349_v50, %v306_v48 }
  0xe6   :  { %v133_v53 = vpop.f32.mrf.mxu0  ;;  %v165_v54 = vpop.f32.mrf.mxu1 }
  0xe7   :  { %v272_v55 = vmax.f32 %v256_v51, 0.0  ;;  %v280_v56 = vmax.f32 %v264_v52, 0.0  ;;  %v254_v57 = vadd.f32 %v306_v48, %v133_v53  ;;  %v262_v58 = vadd.f32 %v306_v48, %v165_v54 }
  0xe8   :  { %v342_v59 = vpop.f32.mrf.mxu0  ;;  %v350_v60 = vpop.f32.mrf.mxu1 }
  0xe9   :  { %288 = vst [vmem:[%s541_s3 + $0x10] sm:$0xff] %v272_v55  ;;  %296 = vst [vmem:[%s541_s3 + $0x50] sm:$0xff] %v280_v56  ;;  %v270_v61 = vmax.f32 %v254_v57, 0.0  ;;  %v278_v62 = vmax.f32 %v262_v58, 0.0  ;;  %v257_v63 = vadd.f32 %v342_v59, %v306_v48  ;;  %v265_v0 = vadd.f32 %v350_v60, %v306_v48 }
  0xea   :  { %v136_v1 = vpop.f32.mrf.mxu0  ;;  %v168_v2 = vpop.f32.mrf.mxu1 }
  0xeb   :  { %286 = vst [vmem:[%s541_s3] sm:$0xff] %v270_v61  ;;  %294 = vst [vmem:[%s541_s3 + $0x40] sm:$0xff] %v278_v62  ;;  %v273_v3 = vmax.f32 %v257_v63, 0.0  ;;  %v281_v4 = vmax.f32 %v265_v0, 0.0  ;;  %v255_v5 = vadd.f32 %v306_v48, %v136_v1  ;;  %v263_v6 = vadd.f32 %v306_v48, %v168_v2 }
  0xec   :  { %v345_v7 = vpop.f32.mrf.mxu0  ;;  %v353_v8 = vpop.f32.mrf.mxu1 }
  0xed   :  { %289 = vst [vmem:[%s541_s3 + $0x18] sm:$0xff] %v273_v3  ;;  %297 = vst [vmem:[%s541_s3 + $0x58] sm:$0xff] %v281_v4  ;;  %v271_v9 = vmax.f32 %v255_v5, 0.0  ;;  %v279_v10 = vmax.f32 %v263_v6, 0.0  ;;  %v260_v11 = vadd.f32 %v345_v7, %v306_v48  ;;  %v268_v12 = vadd.f32 %v353_v8, %v306_v48 }
  0xee   :  { %v149_v13 = vpop.f32.mrf.mxu0  ;;  %v181_v14 = vpop.f32.mrf.mxu1 }
  0xef   :  { %287 = vst [vmem:[%s541_s3 + $0x8] sm:$0xff] %v271_v9  ;;  %295 = vst [vmem:[%s541_s3 + $0x48] sm:$0xff] %v279_v10  ;;  %v276_v15 = vmax.f32 %v260_v11, 0.0  ;;  %v284_v16 = vmax.f32 %v268_v12, 0.0  ;;  %v258_v17 = vadd.f32 %v306_v48, %v149_v13  ;;  %v266_v18 = vadd.f32 %v306_v48, %v181_v14 }
  0xf0   :  { %v346_v19 = vpop.f32.mrf.mxu0  ;;  %v354_v20 = vpop.f32.mrf.mxu1 }
  0xf1   :  { %292 = vst [vmem:[%s541_s3 + $0x30] sm:$0xff] %v276_v15  ;;  %300 = vst [vmem:[%s541_s3 + $0x70] sm:$0xff] %v284_v16  ;;  %v274_v21 = vmax.f32 %v258_v17, 0.0  ;;  %v282_v22 = vmax.f32 %v266_v18, 0.0  ;;  %v261_v23 = vadd.f32 %v346_v19, %v306_v48  ;;  %v269_v24 = vadd.f32 %v354_v20, %v306_v48 }
  0xf2   :  { %v152_v25 = vpop.f32.mrf.mxu0  ;;  %v184_v26 = vpop.f32.mrf.mxu1 }
  0xf3   :  { %290 = vst [vmem:[%s541_s3 + $0x20] sm:$0xff] %v274_v21  ;;  %298 = vst [vmem:[%s541_s3 + $0x60] sm:$0xff] %v282_v22  ;;  %v277_v27 = vmax.f32 %v261_v23, 0.0  ;;  %v285_v28 = vmax.f32 %v269_v24, 0.0  ;;  %v259_v29 = vadd.f32 %v306_v48, %v152_v25  ;;  %v267_v30 = vadd.f32 %v306_v48, %v184_v26 }
  0xf5   :  { %293 = vst [vmem:[%s541_s3 + $0x38] sm:$0xff] %v277_v27  ;;  %301 = vst [vmem:[%s541_s3 + $0x78] sm:$0xff] %v285_v28  ;;  %v275_v31 = vmax.f32 %v259_v29, 0.0  ;;  %v283_v32 = vmax.f32 %v267_v30, 0.0 }
  0xf7   :  { %291 = vst [vmem:[%s541_s3 + $0x28] sm:$0xff] %v275_v31  ;;  %299 = vst [vmem:[%s541_s3 + $0x68] sm:$0xff] %v283_v32 }

// kernel: resgcn_forward.12
= control target key start
LH: loop header
LB: loop body
LE: loop exit
PB: predicated region body
PF: predicated region fallthrough
CT: control target
= control target key end

     0   :  { %8 = vsyncpa [#allocation4], 0  ;;  %s411_s12 = smov [#allocation3]   ;;  %s536_s0 = inlined_call_operand.hbm [shape: f32[128,128], index: 0, kind: input, shape index: {}]   ;;  %s537_s1 = inlined_call_operand.vmem [shape: f32[128,128], index: 1, kind: input, shape index: {}]   ;;  %s538_s2 = inlined_call_operand.vmem [shape: f32[1,128], index: 2, kind: input, shape index: {}]   ;;  %s539_s3 = inlined_call_operand.vmem [shape: f32[128,128], index: 3, kind: output, shape index: {}]  }
   0x1   :  { %s14_s13 = sshll.u32 %s411_s12, 4  ;;  %s15_s13 = int_to_ptr.vmem [resolvable:$true] %s14_s13 }
   0x2   :  { %s397_s14 = scalar_lea.vmem %s15_s13, 2048  ;;  %p402_p1 = scmp.lt.s32.totalorder %s15_s13, %s15_s13 }
   0x3   :  { %p398_p0 = scmp.ne.s32.totalorder %s15_s13, %s397_s14  ;;  %p403_p2 = scmp.lt.s32.totalorder %s397_s14, %s397_s14 }
   0x5   :  { %p404_p3 = por %p403_p2, %p402_p1 }
   0x7   :  { %p405_p4 = pnand %p404_p3, %p398_p0 }
   0x9   :  { %408 = shalt.err (!%p405_p4)
}
   0xa   :  { %s412_s15 = smov 128   ;;  %s413_s16 = smov 8  }
   0xb   :  { %20 = dma.hbm_to_vmem [thread:$0]  %s536_s0, 2048, %s15_s13, [#allocation4], %s412_s15, %s412_s15, %s413_s16  }
   0xc   :  { %409 = dma.done.wait [#allocation4], 2048  }
   0xd   :  { %410 = vsyncadd [#allocation4], 4294965248  ;;  %v103_v0 = vld [vmem:[%s537_s1 + $0x70] sm:$0xff]  ;;  %v104_v1 = vld [vmem:[%s537_s1 + $0x78] sm:$0xff] }
   0xe   :  { %v101_v2 = vld [vmem:[%s537_s1 + $0x60] sm:$0xff]  ;;  %v112_v3 = vpack.c.bf16 %v104_v1, %v103_v0  ;;  %v102_v4 = vld [vmem:[%s537_s1 + $0x68] sm:$0xff]  ;;  %v99_v6 = vld [vmem:[%s537_s1 + $0x50] sm:$0xff] }
   0xf   :  { %v111_v5 = vpack.c.bf16 %v102_v4, %v101_v2  ;;  %v100_v7 = vld [vmem:[%s537_s1 + $0x58] sm:$0xff]  ;;  %v97_v9 = vld [vmem:[%s537_s1 + $0x40] sm:$0xff]  ;;  %v66_v11 = vld [vmem:[#allocation3 + $0x8] sm:$0xff] }
  0x10   :  { %338 = vmatprep.subr.bf16.mxu0 %v112_v3  ;;  %370 = vmatprep.subr.bf16.mxu1 %v112_v3  ;;  %v110_v8 = vpack.c.bf16 %v100_v7, %v99_v6  ;;  %v65_v10 = vld [vmem:[#allocation3] sm:$0xff]  ;;  %v98_v12 = vld [vmem:[%s537_s1 + $0x48] sm:$0xff]  ;;  %v95_v18 = vld [vmem:[%s537_s1 + $0x30] sm:$0xff] }
  0x11   :  { %339 = vmatpush3.bf16.msra.mxu0 %v112_v3  ;;  %378 = vmatpush3.bf16.msra.mxu1 %v112_v3  ;;  %v81_v13 = vpack.c.bf16 %v66_v11, %v65_v10  ;;  %v73_v14 = vld [vmem:[#allocation3 + $0x40] sm:$0xff]  ;;  %v74_v15 = vld [vmem:[#allocation3 + $0x48] sm:$0xff]  ;;  %v109_v17 = vpack.c.bf16 %v98_v12, %v97_v9  ;;  %v96_v19 = vld [vmem:[%s537_s1 + $0x38] sm:$0xff] }
  0x12   :  { %340 = vmatprep.subr.bf16.mxu0 %v111_v5  ;;  %371 = vmatprep.subr.bf16.mxu1 %v111_v5  ;;  %v85_v16 = vpack.c.bf16 %v74_v15, %v73_v14  ;;  %v108_v20 = vpack.c.bf16 %v96_v19, %v95_v18  ;;  %v93_v21 = vld [vmem:[%s537_s1 + $0x20] sm:$0xff]  ;;  %v94_v22 = vld [vmem:[%s537_s1 + $0x28] sm:$0xff]  ;;  %v91_v24 = vld [vmem:[%s537_s1 + $0x10] sm:$0xff] }
  0x13   :  { %354 = vmatprep.mubr.bf16.mxu0 %v81_v13  ;;  %v107_v23 = vpack.c.bf16 %v94_v22, %v93_v21  ;;  %v92_v25 = vld [vmem:[%s537_s1 + $0x18] sm:$0xff]  ;;  %v89_v27 = vld [vmem:[%s537_s1] sm:$0xff]  ;;  %v90_v28 = vld [vmem:[%s537_s1 + $0x8] sm:$0xff] }
  0x14   :  { %362 = vmatprep.mubr.bf16.mxu1 %v85_v16  ;;  %v106_v26 = vpack.c.bf16 %v92_v25, %v91_v24  ;;  %v105_v29 = vpack.c.bf16 %v90_v28, %v89_v27  ;;  %v67_v30 = vld [vmem:[#allocation3 + $0x10] sm:$0xff]  ;;  %v68_v31 = vld [vmem:[#allocation3 + $0x18] sm:$0xff]  ;;  %v69_v34 = vld [vmem:[#allocation3 + $0x20] sm:$0xff] }
  0x15   :  { %341 = vmatpush3.bf16.msra.mxu0 %v111_v5  ;;  %379 = vmatpush3.bf16.msra.mxu1 %v111_v5  ;;  %v75_v32 = vld [vmem:[#allocation3 + $0x50] sm:$0xff]  ;;  %v76_v33 = vld [vmem:[#allocation3 + $0x58] sm:$0xff]  ;;  %v70_v35 = vld [vmem:[#allocation3 + $0x28] sm:$0xff]  ;;  %v82_v38 = vpack.c.bf16 %v68_v31, %v67_v30 }
  0x16   :  { %342 = vmatprep.subr.bf16.mxu0 %v110_v8  ;;  %372 = vmatprep.subr.bf16.mxu1 %v110_v8  ;;  %v77_v36 = vld [vmem:[#allocation3 + $0x60] sm:$0xff]  ;;  %v78_v37 = vld [vmem:[#allocation3 + $0x68] sm:$0xff]  ;;  %v86_v39 = vpack.c.bf16 %v76_v33, %v75_v32  ;;  %v83_v40 = vpack.c.bf16 %v70_v35, %v69_v34  ;;  %v71_v42 = vld [vmem:[#allocation3 + $0x30] sm:$0xff] }
  0x17   :  { %v87_v41 = vpack.c.bf16 %v78_v37, %v77_v36  ;;  %v72_v43 = vld [vmem:[#allocation3 + $0x38] sm:$0xff]  ;;  %v79_v44 = vld [vmem:[#allocation3 + $0x70] sm:$0xff]  ;;  %v321_v48 = vld [vmem:[%s538_s2] ss:$0 sm:$0xff] }
  0x18   :  { %v80_v45 = vld [vmem:[#allocation3 + $0x78] sm:$0xff]  ;;  %v84_v46 = vpack.c.bf16 %v72_v43, %v71_v42 }
  0x19   :  { %343 = vmatpush3.bf16.msra.mxu0 %v110_v8  ;;  %380 = vmatpush3.bf16.msra.mxu1 %v110_v8  ;;  %v88_v47 = vpack.c.bf16 %v80_v45, %v79_v44 }
  0x1a   :  { %344 = vmatprep.subr.bf16.mxu0 %v109_v17  ;;  %373 = vmatprep.subr.bf16.mxu1 %v109_v17 }
  0x1d   :  { %345 = vmatpush3.bf16.msra.mxu0 %v109_v17  ;;  %381 = vmatpush3.bf16.msra.mxu1 %v109_v17 }
  0x1e   :  { %346 = vmatprep.subr.bf16.mxu0 %v108_v20  ;;  %374 = vmatprep.subr.bf16.mxu1 %v108_v20 }
  0x21   :  { %347 = vmatpush3.bf16.msra.mxu0 %v108_v20  ;;  %382 = vmatpush3.bf16.msra.mxu1 %v108_v20 }
  0x22   :  { %348 = vmatprep.subr.bf16.mxu0 %v107_v23  ;;  %375 = vmatprep.subr.bf16.mxu1 %v107_v23 }
  0x25   :  { %349 = vmatpush3.bf16.msra.mxu0 %v107_v23  ;;  %383 = vmatpush3.bf16.msra.mxu1 %v107_v23 }
  0x26   :  { %350 = vmatprep.subr.bf16.mxu0 %v106_v26  ;;  %376 = vmatprep.subr.bf16.mxu1 %v106_v26 }
  0x29   :  { %351 = vmatpush3.bf16.msra.mxu0 %v106_v26  ;;  %384 = vmatpush3.bf16.msra.mxu1 %v106_v26 }
  0x2a   :  { %352 = vmatprep.subr.bf16.mxu0 %v105_v29  ;;  %377 = vmatprep.subr.bf16.mxu1 %v105_v29 }
  0x2d   :  { %353 = vmatpush3.bf16.msra.mxu0 %v105_v29  ;;  %385 = vmatpush3.bf16.msra.mxu1 %v105_v29 }
  0x30   :  { %355 = vmatmul.mubr.bf16.vlgmr.msra.gmra.mxu0 %v82_v38  ;;  %363 = vmatmul.mubr.bf16.vlgmr.msra.gmra.mxu1 %v86_v39 }
  0x31   :  { %358 = vmatprep.mubr.bf16.mxu0 %v83_v40  ;;  %366 = vmatprep.mubr.bf16.mxu1 %v87_v41 }
  0x38   :  { %359 = vmatmul.mubr.bf16.gmra.mxu0 %v84_v46  ;;  %367 = vmatmul.mubr.bf16.gmra.mxu1 %v88_v47 }
  0xf0   :  { %v356_v49 = vpop.f32.mrf.mxu0  ;;  %v364_v50 = vpop.f32.mrf.mxu1 }
  0xf1   :  { %v270_v51 = vadd.f32 %v356_v49, %v321_v48  ;;  %v278_v52 = vadd.f32 %v364_v50, %v321_v48 }
  0xf2   :  { %v147_v53 = vpop.f32.mrf.mxu0  ;;  %v179_v54 = vpop.f32.mrf.mxu1 }
  0xf3   :  { %v286_v55 = vmax.f32 %v270_v51, 0.0  ;;  %v294_v56 = vmax.f32 %v278_v52, 0.0  ;;  %v268_v57 = vadd.f32 %v321_v48, %v147_v53  ;;  %v276_v58 = vadd.f32 %v321_v48, %v179_v54 }
  0xf4   :  { %v357_v59 = vpop.f32.mrf.mxu0  ;;  %v365_v60 = vpop.f32.mrf.mxu1 }
  0xf5   :  { %302 = vst [vmem:[%s539_s3 + $0x10] sm:$0xff] %v286_v55  ;;  %310 = vst [vmem:[%s539_s3 + $0x50] sm:$0xff] %v294_v56  ;;  %v284_v61 = vmax.f32 %v268_v57, 0.0  ;;  %v292_v62 = vmax.f32 %v276_v58, 0.0  ;;  %v271_v63 = vadd.f32 %v357_v59, %v321_v48  ;;  %v279_v0 = vadd.f32 %v365_v60, %v321_v48 }
  0xf6   :  { %v150_v1 = vpop.f32.mrf.mxu0  ;;  %v182_v2 = vpop.f32.mrf.mxu1 }
  0xf7   :  { %300 = vst [vmem:[%s539_s3] sm:$0xff] %v284_v61  ;;  %308 = vst [vmem:[%s539_s3 + $0x40] sm:$0xff] %v292_v62  ;;  %v287_v3 = vmax.f32 %v271_v63, 0.0  ;;  %v295_v4 = vmax.f32 %v279_v0, 0.0  ;;  %v269_v5 = vadd.f32 %v321_v48, %v150_v1  ;;  %v277_v6 = vadd.f32 %v321_v48, %v182_v2 }
  0xf8   :  { %v360_v7 = vpop.f32.mrf.mxu0  ;;  %v368_v8 = vpop.f32.mrf.mxu1 }
  0xf9   :  { %303 = vst [vmem:[%s539_s3 + $0x18] sm:$0xff] %v287_v3  ;;  %311 = vst [vmem:[%s539_s3 + $0x58] sm:$0xff] %v295_v4  ;;  %v285_v9 = vmax.f32 %v269_v5, 0.0  ;;  %v293_v10 = vmax.f32 %v277_v6, 0.0  ;;  %v274_v11 = vadd.f32 %v360_v7, %v321_v48  ;;  %v282_v12 = vadd.f32 %v368_v8, %v321_v48 }
  0xfa   :  { %v163_v13 = vpop.f32.mrf.mxu0  ;;  %v195_v14 = vpop.f32.mrf.mxu1 }
  0xfb   :  { %301 = vst [vmem:[%s539_s3 + $0x8] sm:$0xff] %v285_v9  ;;  %309 = vst [vmem:[%s539_s3 + $0x48] sm:$0xff] %v293_v10  ;;  %v290_v15 = vmax.f32 %v274_v11, 0.0  ;;  %v298_v16 = vmax.f32 %v282_v12, 0.0  ;;  %v272_v17 = vadd.f32 %v321_v48, %v163_v13  ;;  %v280_v18 = vadd.f32 %v321_v48, %v195_v14 }
  0xfc   :  { %v361_v19 = vpop.f32.mrf.mxu0  ;;  %v369_v20 = vpop.f32.mrf.mxu1 }
  0xfd   :  { %306 = vst [vmem:[%s539_s3 + $0x30] sm:$0xff] %v290_v15  ;;  %314 = vst [vmem:[%s539_s3 + $0x70] sm:$0xff] %v298_v16  ;;  %v288_v21 = vmax.f32 %v272_v17, 0.0  ;;  %v296_v22 = vmax.f32 %v280_v18, 0.0  ;;  %v275_v23 = vadd.f32 %v361_v19, %v321_v48  ;;  %v283_v24 = vadd.f32 %v369_v20, %v321_v48 }
  0xfe   :  { %v166_v25 = vpop.f32.mrf.mxu0  ;;  %v198_v26 = vpop.f32.mrf.mxu1 }
  0xff   :  { %304 = vst [vmem:[%s539_s3 + $0x20] sm:$0xff] %v288_v21  ;;  %312 = vst [vmem:[%s539_s3 + $0x60] sm:$0xff] %v296_v22  ;;  %v291_v27 = vmax.f32 %v275_v23, 0.0  ;;  %v299_v28 = vmax.f32 %v283_v24, 0.0  ;;  %v273_v29 = vadd.f32 %v321_v48, %v166_v25  ;;  %v281_v30 = vadd.f32 %v321_v48, %v198_v26 }
 0x101   :  { %307 = vst [vmem:[%s539_s3 + $0x38] sm:$0xff] %v291_v27  ;;  %315 = vst [vmem:[%s539_s3 + $0x78] sm:$0xff] %v299_v28  ;;  %v289_v31 = vmax.f32 %v273_v29, 0.0  ;;  %v297_v32 = vmax.f32 %v281_v30, 0.0 }
 0x103   :  { %305 = vst [vmem:[%s539_s3 + $0x28] sm:$0xff] %v289_v31  ;;  %313 = vst [vmem:[%s539_s3 + $0x68] sm:$0xff] %v297_v32 }
 0x104   :  { %320 = vsyncpa [#allocation4], 1 }

// kernel: resgcn_forward.18
= control target key start
LH: loop header
LB: loop body
LE: loop exit
PB: predicated region body
PF: predicated region fallthrough
CT: control target
= control target key end

     0   :  { %s923_s3 = inlined_call_operand.vmem [shape: f32[128,128], index: 3, kind: input, shape index: {}]   ;;  %s924_s2 = inlined_call_operand.vmem [shape: f32[128,128], index: 2, kind: input, shape index: {}]   ;;  %s925_s1 = inlined_call_operand.vmem [shape: f32[128,128], index: 1, kind: input, shape index: {}]   ;;  %s926_s0 = inlined_call_operand.vmem [shape: f32[128,128], index: 0, kind: input, shape index: {}]   ;;  %s927_s4 = inlined_call_operand.vmem [shape: f32[1,128], index: 4, kind: input, shape index: {}]   ;;  %s928_s5 = inlined_call_operand.vmem [shape: f32[128,128], index: 5, kind: output, shape index: {}]  }
   0x1   :  { %v159_v0 = vld [vmem:[%s923_s3 + $0x70] sm:$0xff]  ;;  %v160_v1 = vld [vmem:[%s923_s3 + $0x78] sm:$0xff]  ;;  %v157_v2 = vld [vmem:[%s923_s3 + $0x60] sm:$0xff] }
   0x2   :  { %v168_v3 = vpack.c.bf16 %v160_v1, %v159_v0  ;;  %v158_v4 = vld [vmem:[%s923_s3 + $0x68] sm:$0xff]  ;;  %v155_v6 = vld [vmem:[%s923_s3 + $0x50] sm:$0xff]  ;;  %v156_v7 = vld [vmem:[%s923_s3 + $0x58] sm:$0xff] }
   0x3   :  { %v167_v5 = vpack.c.bf16 %v158_v4, %v157_v2  ;;  %v166_v8 = vpack.c.bf16 %v156_v7, %v155_v6  ;;  %v153_v9 = vld [vmem:[%s923_s3 + $0x40] sm:$0xff]  ;;  %v154_v10 = vld [vmem:[%s923_s3 + $0x48] sm:$0xff]  ;;  %v39_v15 = vld [vmem:[%s924_s2 + $0x10] sm:$0xff] }
   0x4   :  { %554 = vmatprep.subr.bf16.mxu0 %v168_v3  ;;  %v37_v11 = vld [vmem:[%s924_s2] sm:$0xff]  ;;  %v38_v12 = vld [vmem:[%s924_s2 + $0x8] sm:$0xff]  ;;  %v40_v16 = vld [vmem:[%s924_s2 + $0x18] sm:$0xff]  ;;  %v55_v18 = vmul.f32 -0.5, %v39_v15  ;;  %v165_v21 = vpack.c.bf16 %v154_v10, %v153_v9 }
   0x5   :  { %555 = vmatpush3.bf16.msra.mxu0 %v168_v3  ;;  %v53_v13 = vmul.f32 -0.5, %v37_v11  ;;  %v54_v14 = vmul.f32 -0.5, %v38_v12  ;;  %v151_v17 = vld [vmem:[%s923_s3 + $0x30] sm:$0xff]  ;;  %v56_v19 = vmul.f32 -0.5, %v40_v16  ;;  %v41_v20 = vld [vmem:[%s924_s2 + $0x20] sm:$0xff]  ;;  %v42_v24 = vld [vmem:[%s924_s2 + $0x28] sm:$0xff] }
   0x6   :  { %556 = vmatprep.subr.bf16.mxu0 %v167_v5  ;;  %v57_v25 = vmul.f32 -0.5, %v41_v20  ;;  %v152_v26 = vld [vmem:[%s923_s3 + $0x38] sm:$0xff]  ;;  %v73_v27 = vmul.f32 1.442695, %v55_v18  ;;  %v58_v29 = vmul.f32 -0.5, %v42_v24  ;;  %v43_v31 = vld [vmem:[%s924_s2 + $0x30] sm:$0xff] }
   0x7   :  { %v69_v22 = vmul.f32 1.442695, %v53_v13  ;;  %v71_v23 = vmul.f32 1.442695, %v54_v14  ;;  %v75_v28 = vmul.f32 1.442695, %v56_v19  ;;  %v164_v36 = vpack.c.bf16 %v152_v26, %v151_v17 }
   0x8   :  { %v77_v30 = vmul.f32 1.442695, %v57_v25  ;;  %v44_v32 = vld [vmem:[%s924_s2 + $0x38] sm:$0xff]  ;;  %v79_v33 = vmul.f32 1.442695, %v58_v29  ;;  %v59_v34 = vmul.f32 -0.5, %v43_v31 }
   0x9   :  { %557 = vmatpush3.bf16.msra.mxu0 %v167_v5  ;;  %618 = vpow2.f32 %v69_v22  ;;  %v60_v35 = vmul.f32 -0.5, %v44_v32  ;;  %v149_v37 = vld [vmem:[%s923_s3 + $0x20] sm:$0xff]  ;;  %v46_v39 = vld [vmem:[%s924_s2 + $0x48] sm:$0xff]  ;;  %v47_v45 = vld [vmem:[%s924_s2 + $0x50] sm:$0xff] }
   0xa   :  { %558 = vmatprep.subr.bf16.mxu0 %v166_v8  ;;  %620 = vpow2.f32 %v71_v23  ;;  %v45_v38 = vld [vmem:[%s924_s2 + $0x40] sm:$0xff]  ;;  %v150_v40 = vld [vmem:[%s923_s3 + $0x28] sm:$0xff]  ;;  %v81_v41 = vmul.f32 1.442695, %v59_v34  ;;  %v62_v44 = vmul.f32 -0.5, %v46_v39  ;;  %v48_v46 = vld [vmem:[%s924_s2 + $0x58] sm:$0xff] }
   0xb   :  { %622 = vpow2.f32 %v73_v27  ;;  %v83_v42 = vmul.f32 1.442695, %v60_v35  ;;  %v61_v43 = vmul.f32 -0.5, %v45_v38  ;;  %v49_v48 = vld [vmem:[%s924_s2 + $0x60] sm:$0xff]  ;;  %v163_v49 = vpack.c.bf16 %v150_v40, %v149_v37  ;;  %v50_v52 = vld [vmem:[%s924_s2 + $0x68] sm:$0xff]  ;;  %v147_v53 = vld [vmem:[%s923_s3 + $0x10] sm:$0xff] }
   0xc   :  { %624 = vpow2.f32 %v75_v28  ;;  %v87_v50 = vmul.f32 1.442695, %v62_v44  ;;  %v63_v51 = vmul.f32 -0.5, %v47_v45  ;;  %v148_v54 = vld [vmem:[%s923_s3 + $0x18] sm:$0xff]  ;;  %v64_v55 = vmul.f32 -0.5, %v48_v46  ;;  %v145_v60 = vld [vmem:[%s923_s3] sm:$0xff] }
   0xd   :  { %559 = vmatpush3.bf16.msra.mxu0 %v166_v8  ;;  %626 = vpow2.f32 %v77_v30  ;;  %v85_v47 = vmul.f32 1.442695, %v61_v43  ;;  %v65_v56 = vmul.f32 -0.5, %v49_v48  ;;  %v66_v57 = vmul.f32 -0.5, %v50_v52  ;;  %v146_v61 = vld [vmem:[%s923_s3 + $0x8] sm:$0xff]  ;;  %v21_v62 = vld [vmem:[%s925_s1] sm:$0xff] }
   0xe   :  { %560 = vmatprep.subr.bf16.mxu0 %v165_v21  ;;  %628 = vpow2.f32 %v79_v33  ;;  %v162_v58 = vpack.c.bf16 %v148_v54, %v147_v53  ;;  %v89_v59 = vmul.f32 1.442695, %v63_v51  ;;  %v91_v63 = vmul.f32 1.442695, %v64_v55  ;;  %v22_v0 = vld [vmem:[%s925_s1 + $0x8] sm:$0xff]  ;;  %v51_v2 = vld [vmem:[%s924_s2 + $0x70] sm:$0xff] }
   0xf   :  { %630 = vpow2.f32 %v81_v41  ;;  %v93_v1 = vmul.f32 1.442695, %v65_v56  ;;  %v23_v4 = vld [vmem:[%s925_s1 + $0x10] sm:$0xff]  ;;  %v95_v5 = vmul.f32 1.442695, %v66_v57  ;;  %v52_v6 = vld [vmem:[%s924_s2 + $0x78] sm:$0xff]  ;;  %v161_v8 = vpack.c.bf16 %v146_v61, %v145_v60 }
  0x10   :  { %632 = vpow2.f32 %v83_v42  ;;  %v24_v10 = vld [vmem:[%s925_s1 + $0x18] sm:$0xff]  ;;  %v25_v13 = vld [vmem:[%s925_s1 + $0x20] sm:$0xff]  ;;  %v67_v14 = vmul.f32 -0.5, %v51_v2  ;;  %v26_v17 = vld [vmem:[%s925_s1 + $0x28] sm:$0xff]  ;;  %v68_v18 = vmul.f32 -0.5, %v52_v6 }
  0x11   :  { %561 = vmatpush3.bf16.msra.mxu0 %v165_v21  ;;  %634 = vpow2.f32 %v85_v47  ;;  %v27_v32 = vld [vmem:[%s925_s1 + $0x30] sm:$0xff]  ;;  %v28_v33 = vld [vmem:[%s925_s1 + $0x38] sm:$0xff]  ;;  %v29_v35 = vld [vmem:[%s925_s1 + $0x40] sm:$0xff] }
  0x12   :  { %562 = vmatprep.subr.bf16.mxu0 %v164_v36  ;;  %636 = vpow2.f32 %v87_v50  ;;  %v97_v26 = vmul.f32 1.442695, %v67_v14  ;;  %v99_v29 = vmul.f32 1.442695, %v68_v18  ;;  %v31_v46 = vld [vmem:[%s925_s1 + $0x50] sm:$0xff]  ;;  %v32_v47 = vld [vmem:[%s925_s1 + $0x58] sm:$0xff] }
  0x13   :  { %638 = vpow2.f32 %v89_v59  ;;  %v34_v50 = vld [vmem:[%s925_s1 + $0x68] sm:$0xff]  ;;  %v35_v59 = vld [vmem:[%s925_s1 + $0x70] sm:$0xff]  ;;  %v36_v60 = vld [vmem:[%s925_s1 + $0x78] sm:$0xff] }
  0x14   :  { %640 = vpow2.f32 %v91_v63 }
  0x15   :  { %563 = vmatpush3.bf16.msra.mxu0 %v164_v36  ;;  %642 = vpow2.f32 %v93_v1  ;;  %v30_v36 = vld [vmem:[%s925_s1 + $0x48] sm:$0xff] }
  0x16   :  { %564 = vmatprep.subr.bf16.mxu0 %v163_v49  ;;  %v619_v3 = vpop.eup %618  ;;  %644 = vpow2.f32 %v95_v5  ;;  %v283_v1 = vld [vmem:[%s926_s0 + $0x8] sm:$0xff] }
  0x17   :  { %v621_v7 = vpop.eup %620  ;;  %v101_v9 = vmul.f32 %v619_v3, %v21_v62  ;;  %646 = vpow2.f32 %v97_v26 }
  0x18   :  { %v623_v11 = vpop.eup %622  ;;  %v102_v12 = vmul.f32 %v621_v7, %v22_v0  ;;  %648 = vpow2.f32 %v99_v29  ;;  %v282_v0 = vld [vmem:[%s926_s0] sm:$0xff] }
  0x19   :  { %565 = vmatpush3.bf16.msra.mxu0 %v163_v49  ;;  %v625_v15 = vpop.eup %624  ;;  %v103_v16 = vmul.f32 %v623_v11, %v23_v4  ;;  %v33_v49 = vld [vmem:[%s925_s1 + $0x60] sm:$0xff]  ;;  %v298_v2 = vpack.c.bf16 %v283_v1, %v282_v0 }
  0x1a   :  { %566 = vmatprep.subr.bf16.mxu0 %v162_v58  ;;  %v627_v19 = vpop.eup %626  ;;  %v137_v20 = vpack.c.bf16 %v102_v12, %v101_v9  ;;  %v104_v21 = vmul.f32 %v625_v15, %v24_v10  ;;  %v286_v29 = vld [vmem:[%s926_s0 + $0x20] sm:$0xff] }
  0x1b   :  { %v629_v22 = vpop.eup %628  ;;  %v105_v23 = vmul.f32 %v627_v19, %v25_v13  ;;  %602 = vmatprep.mubr.bf16.mxu1 %v298_v2 }
  0x1c   :  { %v631_v24 = vpop.eup %630  ;;  %570 = vmatprep.mubr.bf16.mxu0 %v137_v20  ;;  %v106_v25 = vmul.f32 %v629_v22, %v26_v17  ;;  %v138_v28 = vpack.c.bf16 %v104_v21, %v103_v16 }
  0x1d   :  { %567 = vmatpush3.bf16.msra.mxu0 %v162_v58  ;;  %v633_v27 = vpop.eup %632  ;;  %v107_v37 = vmul.f32 %v631_v24, %v27_v32 }
  0x1e   :  { %568 = vmatprep.subr.bf16.mxu0 %v161_v8  ;;  %v635_v30 = vpop.eup %634  ;;  %v139_v31 = vpack.c.bf16 %v106_v25, %v105_v23  ;;  %v108_v38 = vmul.f32 %v633_v27, %v28_v33  ;;  %v284_v27 = vld [vmem:[%s926_s0 + $0x10] sm:$0xff] }
  0x1f   :  { %v637_v34 = vpop.eup %636  ;;  %v109_v39 = vmul.f32 %v635_v30, %v29_v35  ;;  %v287_v30 = vld [vmem:[%s926_s0 + $0x28] sm:$0xff]  ;;  %v288_v33 = vld [vmem:[%s926_s0 + $0x30] sm:$0xff]  ;;  %v290_v35 = vld [vmem:[%s926_s0 + $0x40] sm:$0xff] }
  0x20   :  { %v110_v40 = vmul.f32 %v637_v34, %v30_v36  ;;  %v639_v41 = vpop.eup %638  ;;  %v140_v43 = vpack.c.bf16 %v108_v38, %v107_v37  ;;  %v300_v32 = vpack.c.bf16 %v287_v30, %v286_v29  ;;  %v289_v34 = vld [vmem:[%s926_s0 + $0x38] sm:$0xff]  ;;  %v291_v36 = vld [vmem:[%s926_s0 + $0x48] sm:$0xff] }
  0x21   :  { %569 = vmatpush3.bf16.msra.mxu0 %v161_v8  ;;  %v641_v42 = vpop.eup %640  ;;  %v111_v51 = vmul.f32 %v639_v41, %v31_v46  ;;  %v301_v37 = vpack.c.bf16 %v289_v34, %v288_v33  ;;  %v302_v38 = vpack.c.bf16 %v291_v36, %v290_v35  ;;  %v294_v41 = vld [vmem:[%s926_s0 + $0x60] sm:$0xff]  ;;  %v297_v46 = vld [vmem:[%s926_s0 + $0x78] sm:$0xff] }
  0x22   :  { %v643_v44 = vpop.eup %642  ;;  %v141_v45 = vpack.c.bf16 %v110_v40, %v109_v39  ;;  %v112_v52 = vmul.f32 %v641_v42, %v32_v47  ;;  %v292_v39 = vld [vmem:[%s926_s0 + $0x50] sm:$0xff]  ;;  %v293_v40 = vld [vmem:[%s926_s0 + $0x58] sm:$0xff]  ;;  %v295_v42 = vld [vmem:[%s926_s0 + $0x68] sm:$0xff] }
  0x23   :  { %v645_v48 = vpop.eup %644  ;;  %v113_v53 = vmul.f32 %v643_v44, %v33_v49  ;;  %v304_v44 = vpack.c.bf16 %v295_v42, %v294_v41 }
  0x24   :  { %571 = vmatmul.mubr.bf16.vlgmr.msra.gmra.mxu0 %v138_v28  ;;  %v114_v54 = vmul.f32 %v645_v48, %v34_v50  ;;  %v647_v55 = vpop.eup %646  ;;  %v142_v56 = vpack.c.bf16 %v112_v52, %v111_v51  ;;  %v285_v28 = vld [vmem:[%s926_s0 + $0x18] sm:$0xff]  ;;  %v521_v48 = vld [vmem:[%s927_s4] ss:$0 sm:$0xff] }
  0x25   :  { %574 = vmatprep.mubr.bf16.mxu0 %v139_v31  ;;  %v649_v57 = vpop.eup %648  ;;  %v115_v61 = vmul.f32 %v647_v55, %v35_v59  ;;  %v299_v31 = vpack.c.bf16 %v285_v28, %v284_v27 }
  0x26   :  { %v143_v58 = vpack.c.bf16 %v114_v54, %v113_v53  ;;  %v116_v62 = vmul.f32 %v649_v57, %v36_v60 }
  0x28   :  { %v144_v63 = vpack.c.bf16 %v116_v62, %v115_v61 }
  0x2c   :  { %575 = vmatmul.mubr.bf16.gmra.mxu0 %v140_v43  ;;  %v303_v43 = vpack.c.bf16 %v293_v40, %v292_v39 }
  0x2d   :  { %578 = vmatprep.mubr.bf16.mxu0 %v141_v45  ;;  %v296_v45 = vld [vmem:[%s926_s0 + $0x70] sm:$0xff] }
  0x2e   :  { %v305_v47 = vpack.c.bf16 %v297_v46, %v296_v45 }
  0x34   :  { %579 = vmatmul.mubr.bf16.gmra.mxu0 %v142_v56 }
  0x35   :  { %582 = vmatprep.mubr.bf16.mxu0 %v143_v58 }
  0x3c   :  { %583 = vmatmul.mubr.bf16.gmra.mxu0 %v144_v63 }
  0xe4   :  { %v572_v3 = vpop.f32.mrf.mxu0 }
  0xe6   :  { %v203_v4 = vpop.f32.mrf.mxu0 }
  0xe8   :  { %v573_v5 = vpop.f32.mrf.mxu0 }
  0xe9   :  { %v307_v25 = vpack.c.bf16 %v573_v5, %v572_v3 }
  0xea   :  { %v206_v6 = vpop.f32.mrf.mxu0 }
  0xeb   :  { %v306_v26 = vpack.c.bf16 %v206_v6, %v203_v4 }
  0xec   :  { %v576_v7 = vpop.f32.mrf.mxu0 }
  0xee   :  { %v219_v8 = vpop.f32.mrf.mxu0 }
  0xf0   :  { %v577_v9 = vpop.f32.mrf.mxu0 }
  0xf1   :  { %v309_v23 = vpack.c.bf16 %v577_v9, %v576_v7 }
  0xf2   :  { %v222_v10 = vpop.f32.mrf.mxu0 }
  0xf3   :  { %v308_v24 = vpack.c.bf16 %v222_v10, %v219_v8 }
  0xf4   :  { %v580_v11 = vpop.f32.mrf.mxu0 }
  0xf6   :  { %v235_v12 = vpop.f32.mrf.mxu0 }
  0xf8   :  { %v581_v13 = vpop.f32.mrf.mxu0 }
  0xf9   :  { %v311_v21 = vpack.c.bf16 %v581_v13, %v580_v11 }
  0xfa   :  { %v238_v14 = vpop.f32.mrf.mxu0 }
  0xfb   :  { %v310_v22 = vpack.c.bf16 %v238_v14, %v235_v12 }
  0xfc   :  { %v584_v15 = vpop.f32.mrf.mxu0 }
  0xfe   :  { %v251_v16 = vpop.f32.mrf.mxu0 }
 0x100   :  { %v585_v17 = vpop.f32.mrf.mxu0 }
 0x101   :  { %v313_v18 = vpack.c.bf16 %v585_v17, %v584_v15 }
 0x102   :  { %v254_v19 = vpop.f32.mrf.mxu0 }
 0x103   :  { %v312_v20 = vpack.c.bf16 %v254_v19, %v251_v16  ;;  %586 = vmatprep.subr.bf16.mxu1 %v313_v18 }
 0x104   :  { %587 = vmatpush3.bf16.msra.mxu1 %v313_v18 }
 0x105   :  { %588 = vmatprep.subr.bf16.mxu1 %v312_v20 }
 0x108   :  { %589 = vmatpush3.bf16.msra.mxu1 %v312_v20 }
 0x109   :  { %590 = vmatprep.subr.bf16.mxu1 %v311_v21 }
 0x10c   :  { %591 = vmatpush3.bf16.msra.mxu1 %v311_v21 }
 0x10d   :  { %592 = vmatprep.subr.bf16.mxu1 %v310_v22 }
 0x110   :  { %593 = vmatpush3.bf16.msra.mxu1 %v310_v22 }
 0x111   :  { %594 = vmatprep.subr.bf16.mxu1 %v309_v23 }
 0x114   :  { %595 = vmatpush3.bf16.msra.mxu1 %v309_v23 }
 0x115   :  { %596 = vmatprep.subr.bf16.mxu1 %v308_v24 }
 0x118   :  { %597 = vmatpush3.bf16.msra.mxu1 %v308_v24 }
 0x119   :  { %598 = vmatprep.subr.bf16.mxu1 %v307_v25 }
 0x11c   :  { %599 = vmatpush3.bf16.msra.mxu1 %v307_v25 }
 0x11d   :  { %600 = vmatprep.subr.bf16.mxu1 %v306_v26 }
 0x120   :  { %601 = vmatpush3.bf16.msra.mxu1 %v306_v26 }
 0x123   :  { %603 = vmatmul.mubr.bf16.vlgmr.msra.gmra.mxu1 %v299_v31 }
 0x124   :  { %606 = vmatprep.mubr.bf16.mxu1 %v300_v32 }
 0x12b   :  { %607 = vmatmul.mubr.bf16.gmra.mxu1 %v301_v37 }
 0x12c   :  { %610 = vmatprep.mubr.bf16.mxu1 %v302_v38 }
 0x133   :  { %611 = vmatmul.mubr.bf16.gmra.mxu1 %v303_v43 }
 0x134   :  { %614 = vmatprep.mubr.bf16.mxu1 %v304_v44 }
 0x13b   :  { %615 = vmatmul.mubr.bf16.gmra.mxu1 %v305_v47 }
 0x1e3   :  { %v604_v49 = vpop.f32.mrf.mxu1 }
 0x1e4   :  { %v471_v50 = vadd.f32 %v604_v49, %v521_v48 }
 0x1e5   :  { %v348_v51 = vpop.f32.mrf.mxu1 }
 0x1e6   :  { %v487_v52 = vmax.f32 %v471_v50, 0.0  ;;  %v469_v53 = vadd.f32 %v521_v48, %v348_v51 }
 0x1e7   :  { %v605_v54 = vpop.f32.mrf.mxu1 }
 0x1e8   :  { %503 = vst [vmem:[%s928_s5 + $0x10] sm:$0xff] %v487_v52  ;;  %v485_v55 = vmax.f32 %v469_v53, 0.0  ;;  %v472_v56 = vadd.f32 %v605_v54, %v521_v48 }
 0x1e9   :  { %v351_v57 = vpop.f32.mrf.mxu1 }
 0x1ea   :  { %501 = vst [vmem:[%s928_s5] sm:$0xff] %v485_v55  ;;  %v488_v58 = vmax.f32 %v472_v56, 0.0  ;;  %v470_v59 = vadd.f32 %v521_v48, %v351_v57 }
 0x1eb   :  { %v608_v60 = vpop.f32.mrf.mxu1 }
 0x1ec   :  { %504 = vst [vmem:[%s928_s5 + $0x18] sm:$0xff] %v488_v58  ;;  %v486_v61 = vmax.f32 %v470_v59, 0.0  ;;  %v475_v62 = vadd.f32 %v608_v60, %v521_v48 }
 0x1ed   :  { %v364_v63 = vpop.f32.mrf.mxu1 }
 0x1ee   :  { %502 = vst [vmem:[%s928_s5 + $0x8] sm:$0xff] %v486_v61  ;;  %v491_v0 = vmax.f32 %v475_v62, 0.0  ;;  %v473_v1 = vadd.f32 %v521_v48, %v364_v63 }
 0x1ef   :  { %v609_v2 = vpop.f32.mrf.mxu1 }
 0x1f0   :  { %507 = vst [vmem:[%s928_s5 + $0x30] sm:$0xff] %v491_v0  ;;  %v489_v3 = vmax.f32 %v473_v1, 0.0  ;;  %v476_v4 = vadd.f32 %v609_v2, %v521_v48 }
 0x1f1   :  { %v367_v5 = vpop.f32.mrf.mxu1 }
 0x1f2   :  { %505 = vst [vmem:[%s928_s5 + $0x20] sm:$0xff] %v489_v3  ;;  %v492_v6 = vmax.f32 %v476_v4, 0.0  ;;  %v474_v7 = vadd.f32 %v521_v48, %v367_v5 }
 0x1f3   :  { %v612_v8 = vpop.f32.mrf.mxu1 }
 0x1f4   :  { %508 = vst [vmem:[%s928_s5 + $0x38] sm:$0xff] %v492_v6  ;;  %v490_v9 = vmax.f32 %v474_v7, 0.0  ;;  %v479_v10 = vadd.f32 %v612_v8, %v521_v48 }
 0x1f5   :  { %v380_v11 = vpop.f32.mrf.mxu1 }
 0x1f6   :  { %506 = vst [vmem:[%s928_s5 + $0x28] sm:$0xff] %v490_v9  ;;  %v495_v12 = vmax.f32 %v479_v10, 0.0  ;;  %v477_v13 = vadd.f32 %v521_v48, %v380_v11 }
 0x1f7   :  { %v613_v14 = vpop.f32.mrf.mxu1 }
 0x1f8   :  { %511 = vst [vmem:[%s928_s5 + $0x50] sm:$0xff] %v495_v12  ;;  %v493_v15 = vmax.f32 %v477_v13, 0.0  ;;  %v480_v16 = vadd.f32 %v613_v14, %v521_v48 }
 0x1f9   :  { %v383_v17 = vpop.f32.mrf.mxu1 }
 0x1fa   :  { %509 = vst [vmem:[%s928_s5 + $0x40] sm:$0xff] %v493_v15  ;;  %v496_v18 = vmax.f32 %v480_v16, 0.0  ;;  %v478_v19 = vadd.f32 %v521_v48, %v383_v17 }
 0x1fb   :  { %v616_v20 = vpop.f32.mrf.mxu1 }
 0x1fc   :  { %512 = vst [vmem:[%s928_s5 + $0x58] sm:$0xff] %v496_v18  ;;  %v494_v21 = vmax.f32 %v478_v19, 0.0  ;;  %v483_v22 = vadd.f32 %v616_v20, %v521_v48 }
 0x1fd   :  { %v396_v23 = vpop.f32.mrf.mxu1 }
 0x1fe   :  { %510 = vst [vmem:[%s928_s5 + $0x48] sm:$0xff] %v494_v21  ;;  %v499_v24 = vmax.f32 %v483_v22, 0.0  ;;  %v481_v25 = vadd.f32 %v521_v48, %v396_v23 }
 0x1ff   :  { %v617_v26 = vpop.f32.mrf.mxu1 }
 0x200   :  { %515 = vst [vmem:[%s928_s5 + $0x70] sm:$0xff] %v499_v24  ;;  %v497_v27 = vmax.f32 %v481_v25, 0.0  ;;  %v484_v28 = vadd.f32 %v617_v26, %v521_v48 }
 0x201   :  { %v399_v29 = vpop.f32.mrf.mxu1 }
 0x202   :  { %513 = vst [vmem:[%s928_s5 + $0x60] sm:$0xff] %v497_v27  ;;  %v500_v30 = vmax.f32 %v484_v28, 0.0  ;;  %v482_v31 = vadd.f32 %v521_v48, %v399_v29 }
 0x204   :  { %516 = vst [vmem:[%s928_s5 + $0x78] sm:$0xff] %v500_v30  ;;  %v498_v32 = vmax.f32 %v482_v31, 0.0 }
 0x206   :  { %514 = vst [vmem:[%s928_s5 + $0x68] sm:$0xff] %v498_v32 }

// kernel: resgcn_forward.16
= control target key start
LH: loop header
LB: loop body
LE: loop exit
PB: predicated region body
PF: predicated region fallthrough
CT: control target
= control target key end

     0   :  { %s755_s2 = inlined_call_operand.vmem [shape: f32[128,128], index: 2, kind: input, shape index: {}]   ;;  %s756_s1 = inlined_call_operand.vmem [shape: f32[128,128], index: 1, kind: input, shape index: {}]   ;;  %s757_s0 = inlined_call_operand.vmem [shape: f32[128,128], index: 0, kind: input, shape index: {}]   ;;  %s758_s3 = inlined_call_operand.vmem [shape: f32[1,128], index: 3, kind: input, shape index: {}]   ;;  %s759_s4 = inlined_call_operand.vmem [shape: f32[128,128], index: 4, kind: output, shape index: {}]  }
   0x1   :  { %v76_v0 = vld [vmem:[%s755_s2 + $0x70] sm:$0xff]  ;;  %v77_v1 = vld [vmem:[%s755_s2 + $0x78] sm:$0xff]  ;;  %v74_v2 = vld [vmem:[%s755_s2 + $0x60] sm:$0xff] }
   0x2   :  { %v85_v3 = vpack.c.bf16 %v77_v1, %v76_v0  ;;  %v75_v4 = vld [vmem:[%s755_s2 + $0x68] sm:$0xff]  ;;  %v72_v6 = vld [vmem:[%s755_s2 + $0x50] sm:$0xff]  ;;  %v73_v7 = vld [vmem:[%s755_s2 + $0x58] sm:$0xff] }
   0x3   :  { %v84_v5 = vpack.c.bf16 %v75_v4, %v74_v2  ;;  %v83_v8 = vpack.c.bf16 %v73_v7, %v72_v6  ;;  %v18_v9 = vld [vmem:[%s756_s1] sm:$0xff]  ;;  %v19_v10 = vld [vmem:[%s756_s1 + $0x8] sm:$0xff]  ;;  %v68_v15 = vld [vmem:[%s755_s2 + $0x30] sm:$0xff] }
   0x4   :  { %471 = vmatprep.subr.bf16.mxu0 %v85_v3  ;;  %v70_v11 = vld [vmem:[%s755_s2 + $0x40] sm:$0xff]  ;;  %v71_v12 = vld [vmem:[%s755_s2 + $0x48] sm:$0xff]  ;;  %v54_v13 = vpack.c.bf16 %v19_v10, %v18_v9  ;;  %v69_v16 = vld [vmem:[%s755_s2 + $0x38] sm:$0xff] }
   0x5   :  { %472 = vmatpush3.bf16.msra.mxu0 %v85_v3  ;;  %v82_v14 = vpack.c.bf16 %v71_v12, %v70_v11  ;;  %v81_v17 = vpack.c.bf16 %v69_v16, %v68_v15  ;;  %v66_v18 = vld [vmem:[%s755_s2 + $0x20] sm:$0xff]  ;;  %v67_v19 = vld [vmem:[%s755_s2 + $0x28] sm:$0xff]  ;;  %v64_v21 = vld [vmem:[%s755_s2 + $0x10] sm:$0xff] }
   0x6   :  { %473 = vmatprep.subr.bf16.mxu0 %v84_v5  ;;  %487 = vmatprep.mubr.bf16.mxu0 %v54_v13  ;;  %v80_v20 = vpack.c.bf16 %v67_v19, %v66_v18  ;;  %v65_v22 = vld [vmem:[%s755_s2 + $0x18] sm:$0xff]  ;;  %v62_v24 = vld [vmem:[%s755_s2] sm:$0xff]  ;;  %v63_v25 = vld [vmem:[%s755_s2 + $0x8] sm:$0xff] }
   0x7   :  { %v79_v23 = vpack.c.bf16 %v65_v22, %v64_v21  ;;  %v78_v26 = vpack.c.bf16 %v63_v25, %v62_v24  ;;  %v20_v27 = vld [vmem:[%s756_s1 + $0x10] sm:$0xff]  ;;  %v21_v28 = vld [vmem:[%s756_s1 + $0x18] sm:$0xff]  ;;  %v22_v29 = vld [vmem:[%s756_s1 + $0x20] sm:$0xff] }
   0x8   :  { %v23_v30 = vld [vmem:[%s756_s1 + $0x28] sm:$0xff]  ;;  %v55_v31 = vpack.c.bf16 %v21_v28, %v20_v27  ;;  %v24_v33 = vld [vmem:[%s756_s1 + $0x30] sm:$0xff]  ;;  %v25_v34 = vld [vmem:[%s756_s1 + $0x38] sm:$0xff] }
   0x9   :  { %474 = vmatpush3.bf16.msra.mxu0 %v84_v5  ;;  %v56_v32 = vpack.c.bf16 %v23_v30, %v22_v29  ;;  %v26_v35 = vld [vmem:[%s756_s1 + $0x40] sm:$0xff]  ;;  %v27_v36 = vld [vmem:[%s756_s1 + $0x48] sm:$0xff]  ;;  %v57_v37 = vpack.c.bf16 %v25_v34, %v24_v33  ;;  %v28_v39 = vld [vmem:[%s756_s1 + $0x50] sm:$0xff] }
   0xa   :  { %475 = vmatprep.subr.bf16.mxu0 %v83_v8  ;;  %v58_v38 = vpack.c.bf16 %v27_v36, %v26_v35  ;;  %v29_v40 = vld [vmem:[%s756_s1 + $0x58] sm:$0xff]  ;;  %v30_v41 = vld [vmem:[%s756_s1 + $0x60] sm:$0xff]  ;;  %v31_v42 = vld [vmem:[%s756_s1 + $0x68] sm:$0xff] }
   0xb   :  { %v59_v43 = vpack.c.bf16 %v29_v40, %v28_v39  ;;  %v60_v44 = vpack.c.bf16 %v31_v42, %v30_v41  ;;  %v32_v45 = vld [vmem:[%s756_s1 + $0x70] sm:$0xff]  ;;  %v33_v46 = vld [vmem:[%s756_s1 + $0x78] sm:$0xff]  ;;  %v199_v48 = vld [vmem:[%s757_s0] sm:$0xff] }
   0xc   :  { %v61_v47 = vpack.c.bf16 %v33_v46, %v32_v45  ;;  %v200_v49 = vld [vmem:[%s757_s0 + $0x8] sm:$0xff]  ;;  %v201_v11 = vld [vmem:[%s757_s0 + $0x10] sm:$0xff]  ;;  %v202_v12 = vld [vmem:[%s757_s0 + $0x18] sm:$0xff] }
   0xd   :  { %476 = vmatpush3.bf16.msra.mxu0 %v83_v8  ;;  %v215_v50 = vpack.c.bf16 %v200_v49, %v199_v48  ;;  %v203_v13 = vld [vmem:[%s757_s0 + $0x20] sm:$0xff]  ;;  %v216_v15 = vpack.c.bf16 %v202_v12, %v201_v11  ;;  %v206_v18 = vld [vmem:[%s757_s0 + $0x38] sm:$0xff]  ;;  %v213_v29 = vld [vmem:[%s757_s0 + $0x70] sm:$0xff] }
   0xe   :  { %477 = vmatprep.subr.bf16.mxu0 %v82_v14  ;;  %v207_v19 = vld [vmem:[%s757_s0 + $0x40] sm:$0xff]  ;;  %v210_v24 = vld [vmem:[%s757_s0 + $0x58] sm:$0xff] }
   0xf   :  { %519 = vmatprep.mubr.bf16.mxu1 %v215_v50  ;;  %v211_v25 = vld [vmem:[%s757_s0 + $0x60] sm:$0xff]  ;;  %v214_v30 = vld [vmem:[%s757_s0 + $0x78] sm:$0xff] }
  0x11   :  { %478 = vmatpush3.bf16.msra.mxu0 %v82_v14  ;;  %v204_v14 = vld [vmem:[%s757_s0 + $0x28] sm:$0xff] }
  0x12   :  { %479 = vmatprep.subr.bf16.mxu0 %v81_v17  ;;  %v217_v16 = vpack.c.bf16 %v204_v14, %v203_v13 }
  0x15   :  { %480 = vmatpush3.bf16.msra.mxu0 %v81_v17  ;;  %v205_v17 = vld [vmem:[%s757_s0 + $0x30] sm:$0xff] }
  0x16   :  { %481 = vmatprep.subr.bf16.mxu0 %v80_v20  ;;  %v218_v21 = vpack.c.bf16 %v206_v18, %v205_v17 }
  0x19   :  { %482 = vmatpush3.bf16.msra.mxu0 %v80_v20  ;;  %v208_v20 = vld [vmem:[%s757_s0 + $0x48] sm:$0xff] }
  0x1a   :  { %483 = vmatprep.subr.bf16.mxu0 %v79_v23  ;;  %v219_v22 = vpack.c.bf16 %v208_v20, %v207_v19 }
  0x1d   :  { %484 = vmatpush3.bf16.msra.mxu0 %v79_v23  ;;  %v209_v23 = vld [vmem:[%s757_s0 + $0x50] sm:$0xff] }
  0x1e   :  { %485 = vmatprep.subr.bf16.mxu0 %v78_v26  ;;  %v220_v27 = vpack.c.bf16 %v210_v24, %v209_v23 }
  0x21   :  { %486 = vmatpush3.bf16.msra.mxu0 %v78_v26  ;;  %v212_v26 = vld [vmem:[%s757_s0 + $0x68] sm:$0xff] }
  0x22   :  { %v221_v28 = vpack.c.bf16 %v212_v26, %v211_v25 }
  0x24   :  { %488 = vmatmul.mubr.bf16.vlgmr.msra.gmra.mxu0 %v55_v31  ;;  %v222_v31 = vpack.c.bf16 %v214_v30, %v213_v29 }
  0x25   :  { %491 = vmatprep.mubr.bf16.mxu0 %v56_v32  ;;  %v438_v32 = vld [vmem:[%s758_s3] ss:$0 sm:$0xff] }
  0x2c   :  { %492 = vmatmul.mubr.bf16.gmra.mxu0 %v57_v37 }
  0x2d   :  { %495 = vmatprep.mubr.bf16.mxu0 %v58_v38 }
  0x34   :  { %496 = vmatmul.mubr.bf16.gmra.mxu0 %v59_v43 }
  0x35   :  { %499 = vmatprep.mubr.bf16.mxu0 %v60_v44 }
  0x3c   :  { %500 = vmatmul.mubr.bf16.gmra.mxu0 %v61_v47 }
  0xe4   :  { %v489_v51 = vpop.f32.mrf.mxu0 }
  0xe6   :  { %v120_v52 = vpop.f32.mrf.mxu0 }
  0xe8   :  { %v490_v53 = vpop.f32.mrf.mxu0 }
  0xe9   :  { %v224_v9 = vpack.c.bf16 %v490_v53, %v489_v51 }
  0xea   :  { %v123_v54 = vpop.f32.mrf.mxu0 }
  0xeb   :  { %v223_v10 = vpack.c.bf16 %v123_v54, %v120_v52 }
  0xec   :  { %v493_v55 = vpop.f32.mrf.mxu0 }
  0xee   :  { %v136_v56 = vpop.f32.mrf.mxu0 }
  0xf0   :  { %v494_v57 = vpop.f32.mrf.mxu0 }
  0xf1   :  { %v226_v7 = vpack.c.bf16 %v494_v57, %v493_v55 }
  0xf2   :  { %v139_v58 = vpop.f32.mrf.mxu0 }
  0xf3   :  { %v225_v8 = vpack.c.bf16 %v139_v58, %v136_v56 }
  0xf4   :  { %v497_v59 = vpop.f32.mrf.mxu0 }
  0xf6   :  { %v152_v60 = vpop.f32.mrf.mxu0 }
  0xf8   :  { %v498_v61 = vpop.f32.mrf.mxu0 }
  0xf9   :  { %v228_v5 = vpack.c.bf16 %v498_v61, %v497_v59 }
  0xfa   :  { %v155_v62 = vpop.f32.mrf.mxu0 }
  0xfb   :  { %v227_v6 = vpack.c.bf16 %v155_v62, %v152_v60 }
  0xfc   :  { %v501_v63 = vpop.f32.mrf.mxu0 }
  0xfe   :  { %v168_v0 = vpop.f32.mrf.mxu0 }
 0x100   :  { %v502_v1 = vpop.f32.mrf.mxu0 }
 0x101   :  { %v230_v2 = vpack.c.bf16 %v502_v1, %v501_v63 }
 0x102   :  { %v171_v3 = vpop.f32.mrf.mxu0 }
 0x103   :  { %v229_v4 = vpack.c.bf16 %v171_v3, %v168_v0  ;;  %503 = vmatprep.subr.bf16.mxu1 %v230_v2 }
 0x104   :  { %504 = vmatpush3.bf16.msra.mxu1 %v230_v2 }
 0x105   :  { %505 = vmatprep.subr.bf16.mxu1 %v229_v4 }
 0x108   :  { %506 = vmatpush3.bf16.msra.mxu1 %v229_v4 }
 0x109   :  { %507 = vmatprep.subr.bf16.mxu1 %v228_v5 }
 0x10c   :  { %508 = vmatpush3.bf16.msra.mxu1 %v228_v5 }
 0x10d   :  { %509 = vmatprep.subr.bf16.mxu1 %v227_v6 }
 0x110   :  { %510 = vmatpush3.bf16.msra.mxu1 %v227_v6 }
 0x111   :  { %511 = vmatprep.subr.bf16.mxu1 %v226_v7 }
 0x114   :  { %512 = vmatpush3.bf16.msra.mxu1 %v226_v7 }
 0x115   :  { %513 = vmatprep.subr.bf16.mxu1 %v225_v8 }
 0x118   :  { %514 = vmatpush3.bf16.msra.mxu1 %v225_v8 }
 0x119   :  { %515 = vmatprep.subr.bf16.mxu1 %v224_v9 }
 0x11c   :  { %516 = vmatpush3.bf16.msra.mxu1 %v224_v9 }
 0x11d   :  { %517 = vmatprep.subr.bf16.mxu1 %v223_v10 }
 0x120   :  { %518 = vmatpush3.bf16.msra.mxu1 %v223_v10 }
 0x123   :  { %520 = vmatmul.mubr.bf16.vlgmr.msra.gmra.mxu1 %v216_v15 }
 0x124   :  { %523 = vmatprep.mubr.bf16.mxu1 %v217_v16 }
 0x12b   :  { %524 = vmatmul.mubr.bf16.gmra.mxu1 %v218_v21 }
 0x12c   :  { %527 = vmatprep.mubr.bf16.mxu1 %v219_v22 }
 0x133   :  { %528 = vmatmul.mubr.bf16.gmra.mxu1 %v220_v27 }
 0x134   :  { %531 = vmatprep.mubr.bf16.mxu1 %v221_v28 }
 0x13b   :  { %532 = vmatmul.mubr.bf16.gmra.mxu1 %v222_v31 }
 0x1e3   :  { %v521_v33 = vpop.f32.mrf.mxu1 }
 0x1e4   :  { %v388_v34 = vadd.f32 %v521_v33, %v438_v32 }
 0x1e5   :  { %v265_v35 = vpop.f32.mrf.mxu1 }
 0x1e6   :  { %v404_v36 = vmax.f32 %v388_v34, 0.0  ;;  %v386_v37 = vadd.f32 %v438_v32, %v265_v35 }
 0x1e7   :  { %v522_v38 = vpop.f32.mrf.mxu1 }
 0x1e8   :  { %420 = vst [vmem:[%s759_s4 + $0x10] sm:$0xff] %v404_v36  ;;  %v402_v39 = vmax.f32 %v386_v37, 0.0  ;;  %v389_v40 = vadd.f32 %v522_v38, %v438_v32 }
 0x1e9   :  { %v268_v41 = vpop.f32.mrf.mxu1 }
 0x1ea   :  { %418 = vst [vmem:[%s759_s4] sm:$0xff] %v402_v39  ;;  %v405_v42 = vmax.f32 %v389_v40, 0.0  ;;  %v387_v43 = vadd.f32 %v438_v32, %v268_v41 }
 0x1eb   :  { %v525_v44 = vpop.f32.mrf.mxu1 }
 0x1ec   :  { %421 = vst [vmem:[%s759_s4 + $0x18] sm:$0xff] %v405_v42  ;;  %v403_v45 = vmax.f32 %v387_v43, 0.0  ;;  %v392_v46 = vadd.f32 %v525_v44, %v438_v32 }
 0x1ed   :  { %v281_v47 = vpop.f32.mrf.mxu1 }
 0x1ee   :  { %419 = vst [vmem:[%s759_s4 + $0x8] sm:$0xff] %v403_v45  ;;  %v408_v48 = vmax.f32 %v392_v46, 0.0  ;;  %v390_v49 = vadd.f32 %v438_v32, %v281_v47 }
 0x1ef   :  { %v526_v50 = vpop.f32.mrf.mxu1 }
 0x1f0   :  { %424 = vst [vmem:[%s759_s4 + $0x30] sm:$0xff] %v408_v48  ;;  %v406_v51 = vmax.f32 %v390_v49, 0.0  ;;  %v393_v52 = vadd.f32 %v526_v50, %v438_v32 }
 0x1f1   :  { %v284_v53 = vpop.f32.mrf.mxu1 }
 0x1f2   :  { %422 = vst [vmem:[%s759_s4 + $0x20] sm:$0xff] %v406_v51  ;;  %v409_v54 = vmax.f32 %v393_v52, 0.0  ;;  %v391_v55 = vadd.f32 %v438_v32, %v284_v53 }
 0x1f3   :  { %v529_v56 = vpop.f32.mrf.mxu1 }
 0x1f4   :  { %425 = vst [vmem:[%s759_s4 + $0x38] sm:$0xff] %v409_v54  ;;  %v407_v57 = vmax.f32 %v391_v55, 0.0  ;;  %v396_v58 = vadd.f32 %v529_v56, %v438_v32 }
 0x1f5   :  { %v297_v59 = vpop.f32.mrf.mxu1 }
 0x1f6   :  { %423 = vst [vmem:[%s759_s4 + $0x28] sm:$0xff] %v407_v57  ;;  %v412_v60 = vmax.f32 %v396_v58, 0.0  ;;  %v394_v61 = vadd.f32 %v438_v32, %v297_v59 }
 0x1f7   :  { %v530_v62 = vpop.f32.mrf.mxu1 }
 0x1f8   :  { %428 = vst [vmem:[%s759_s4 + $0x50] sm:$0xff] %v412_v60  ;;  %v410_v63 = vmax.f32 %v394_v61, 0.0  ;;  %v397_v0 = vadd.f32 %v530_v62, %v438_v32 }
 0x1f9   :  { %v300_v1 = vpop.f32.mrf.mxu1 }
 0x1fa   :  { %426 = vst [vmem:[%s759_s4 + $0x40] sm:$0xff] %v410_v63  ;;  %v413_v2 = vmax.f32 %v397_v0, 0.0  ;;  %v395_v3 = vadd.f32 %v438_v32, %v300_v1 }
 0x1fb   :  { %v533_v4 = vpop.f32.mrf.mxu1 }
 0x1fc   :  { %429 = vst [vmem:[%s759_s4 + $0x58] sm:$0xff] %v413_v2  ;;  %v411_v5 = vmax.f32 %v395_v3, 0.0  ;;  %v400_v6 = vadd.f32 %v533_v4, %v438_v32 }
 0x1fd   :  { %v313_v7 = vpop.f32.mrf.mxu1 }
 0x1fe   :  { %427 = vst [vmem:[%s759_s4 + $0x48] sm:$0xff] %v411_v5  ;;  %v416_v8 = vmax.f32 %v400_v6, 0.0  ;;  %v398_v9 = vadd.f32 %v438_v32, %v313_v7 }
 0x1ff   :  { %v534_v10 = vpop.f32.mrf.mxu1 }
 0x200   :  { %432 = vst [vmem:[%s759_s4 + $0x70] sm:$0xff] %v416_v8  ;;  %v414_v11 = vmax.f32 %v398_v9, 0.0  ;;  %v401_v12 = vadd.f32 %v534_v10, %v438_v32 }
 0x201   :  { %v316_v13 = vpop.f32.mrf.mxu1 }
 0x202   :  { %430 = vst [vmem:[%s759_s4 + $0x60] sm:$0xff] %v414_v11  ;;  %v417_v14 = vmax.f32 %v401_v12, 0.0  ;;  %v399_v15 = vadd.f32 %v438_v32, %v316_v13 }
 0x204   :  { %433 = vst [vmem:[%s759_s4 + $0x78] sm:$0xff] %v417_v14  ;;  %v415_v16 = vmax.f32 %v399_v15, 0.0 }
 0x206   :  { %431 = vst [vmem:[%s759_s4 + $0x68] sm:$0xff] %v415_v16 }

// kernel: resgcn_forward.15
= control target key start
LH: loop header
LB: loop body
LE: loop exit
PB: predicated region body
PF: predicated region fallthrough
CT: control target
= control target key end

     0   :  { %v328_v0 = vmov 0   ;;  %v15_v33 = vlaneseq  ;;  %v329_v40 = vmov 0.0   ;;  %s568_s1 = inlined_call_operand.vmem [shape: f32[128,1], index: 1, kind: input, shape index: {}]   ;;  %s569_s2 = inlined_call_operand.vmem [shape: f32[1,128], index: 2, kind: input, shape index: {}]   ;;  %s570_s0 = inlined_call_operand.vmem [shape: f32[128,128], index: 0, kind: input, shape index: {}]   ;;  %s571_s3 = inlined_call_operand.vmem [shape: f32[128,128], index: 3, kind: output, shape index: {}]  }
   0x1   :  { %293 = vset.pattern.permute.xlu1 %v328_v0  ;;  %292 = vset.pattern.permute.xlu0 %v328_v0  ;;  %v120_v1 = vld [vmem:[%s568_s1 + $0x10] sm:$0xff]  ;;  %v118_v2 = vld [vmem:[%s568_s1] sm:$0xff]  ;;  %v121_v3 = vld [vmem:[%s568_s1 + $0x18] sm:$0xff] }
   0x2   :  { %294 = vrsqrt.f32 %v120_v1  ;;  %v119_v4 = vld [vmem:[%s568_s1 + $0x8] sm:$0xff]  ;;  %v122_v6 = vld [vmem:[%s568_s1 + $0x20] sm:$0xff]  ;;  %v125_v7 = vld [vmem:[%s568_s1 + $0x38] sm:$0xff]  ;;  %v401_v35 = vshrl.u32 %v15_v33, 7  ;;  %v404_v37 = vand.u32 127, %v15_v33 }
   0x3   :  { %296 = vrsqrt.f32 %v118_v2  ;;  %v123_v5 = vld [vmem:[%s568_s1 + $0x28] sm:$0xff]  ;;  %v124_v8 = vld [vmem:[%s568_s1 + $0x30] sm:$0xff]  ;;  %v126_v10 = vld [vmem:[%s568_s1 + $0x40] sm:$0xff] }
   0x4   :  { %298 = vrsqrt.f32 %v121_v3  ;;  %v127_v9 = vld [vmem:[%s568_s1 + $0x48] sm:$0xff]  ;;  %v129_v14 = vld [vmem:[%s568_s1 + $0x58] sm:$0xff]  ;;  %v128_v16 = vld [vmem:[%s568_s1 + $0x50] sm:$0xff]  ;;  %v18_v36 = vadd.s32 16, %v401_v35  ;;  %v19_v38 = vadd.s32 24, %v401_v35  ;;  %vm70_vm1 = vcmp.eq.s32.totalorder %v401_v35, %v404_v37 }
   0x5   :  { %300 = vrsqrt.f32 %v119_v4  ;;  %v131_v18 = vld [vmem:[%s568_s1 + $0x68] sm:$0xff]  ;;  %v130_v20 = vld [vmem:[%s568_s1 + $0x60] sm:$0xff]  ;;  %v133_v22 = vld [vmem:[%s568_s1 + $0x78] sm:$0xff]  ;;  %v17_v39 = vadd.s32 8, %v401_v35  ;;  %v251_v43 = vsub.s32 0, %v401_v35  ;;  %v86_v44 = vsel %vm70_vm1, 1.0, %v329_v40 }
   0x6   :  { %302 = vrsqrt.f32 %v123_v5  ;;  %v132_v24 = vld [vmem:[%s568_s1 + $0x70] sm:$0xff]  ;;  %v150_v34 = vld [vmem:[%s569_s2] sm:$0x1]  ;;  %vm72_vm0 = vcmp.eq.s32.totalorder %v18_v36, %v404_v37  ;;  %vm73_vm2 = vcmp.eq.s32.totalorder %v19_v38, %v404_v37  ;;  %v21_v46 = vadd.s32 40, %v401_v35  ;;  %v57_v52 = vld [vmem:[%s570_s0 + $0x18] sm:$0xff] }
   0x7   :  { %304 = vrsqrt.f32 %v122_v6  ;;  %v88_v41 = vsel %vm72_vm0, 1.0, %v329_v40  ;;  %v56_v42 = vld [vmem:[%s570_s0 + $0x10] sm:$0xff]  ;;  %v54_v45 = vld [vmem:[%s570_s0] sm:$0xff]  ;;  %vm71_vm3 = vcmp.eq.s32.totalorder %v17_v39, %v404_v37  ;;  %v20_v48 = vadd.s32 32, %v401_v35  ;;  %v55_v55 = vld [vmem:[%s570_s0 + $0x8] sm:$0xff] }
   0x8   :  { %306 = vrsqrt.f32 %v125_v7  ;;  %v104_v49 = vadd.f32 %v88_v41, %v56_v42  ;;  %v102_v50 = vadd.f32 %v86_v44, %v54_v45  ;;  %v89_v51 = vsel %vm73_vm2, 1.0, %v329_v40  ;;  %v59_v1 = vld [vmem:[%s570_s0 + $0x28] sm:$0xff]  ;;  %v58_v4 = vld [vmem:[%s570_s0 + $0x20] sm:$0xff] }
   0x9   :  { %308 = vrsqrt.f32 %v124_v8  ;;  %v87_v54 = vsel %vm71_vm3, 1.0, %v329_v40  ;;  %vm75_vm4 = vcmp.eq.s32.totalorder %v21_v46, %v404_v37  ;;  %v23_v56 = vadd.s32 56, %v401_v35  ;;  %v65_v46 = vld [vmem:[%s570_s0 + $0x58] sm:$0xff] }
   0xa   :  { %310 = vrsqrt.f32 %v127_v9  ;;  %vm74_vm5 = vcmp.eq.s32.totalorder %v20_v48, %v404_v37  ;;  %v22_v58 = vadd.s32 48, %v401_v35  ;;  %v105_v61 = vadd.f32 %v89_v51, %v57_v52 }
   0xb   :  { %312 = vrsqrt.f32 %v126_v10  ;;  %v103_v63 = vadd.f32 %v87_v54, %v55_v55  ;;  %v91_v0 = vsel %vm75_vm4, 1.0, %v329_v40  ;;  %v90_v3 = vsel %vm74_vm5, 1.0, %v329_v40 }
   0xc   :  { %314 = vrsqrt.f32 %v129_v14  ;;  %vm77_vm6 = vcmp.eq.s32.totalorder %v23_v56, %v404_v37  ;;  %v25_v5 = vadd.s32 72, %v401_v35  ;;  %vm76_vm7 = vcmp.eq.s32.totalorder %v22_v58, %v404_v37 }
   0xd   :  { %316 = vrsqrt.f32 %v128_v16  ;;  %v24_v8 = vadd.s32 64, %v401_v35  ;;  %v93_v14 = vsel %vm77_vm6, 1.0, %v329_v40  ;;  %v29_v33 = vadd.s32 104, %v401_v35 }
   0xe   :  { %318 = vrsqrt.f32 %v131_v18  ;;  %v60_v18 = vld [vmem:[%s570_s0 + $0x30] sm:$0xff]  ;;  %vm79_vm8 = vcmp.eq.s32.totalorder %v25_v5, %v404_v37  ;;  %v28_v38 = vadd.s32 96, %v401_v35  ;;  %v30_v54 = vadd.s32 112, %v401_v35 }
   0xf   :  { %v295_v11 = vpop.eup %294  ;;  %320 = vrsqrt.f32 %v130_v20  ;;  %vm78_vm9 = vcmp.eq.s32.totalorder %v24_v8, %v404_v37  ;;  %vm83_vm12 = vcmp.eq.s32.totalorder %v29_v33, %v404_v37  ;;  %v69_v8 = vld [vmem:[%s570_s0 + $0x78] sm:$0xff] }
  0x10   :  { %v297_v12 = vpop.eup %296  ;;  %164 = vperm.xlu1 %293, %v295_v11   ;;  %322 = vrsqrt.f32 %v133_v22  ;;  %v107_v11 = vadd.f32 %v91_v0, %v59_v1  ;;  %v26_v22 = vadd.s32 80, %v401_v35  ;;  %vm82_vm13 = vcmp.eq.s32.totalorder %v28_v38, %v404_v37 }
  0x11   :  { %v299_v13 = vpop.eup %298  ;;  %154 = vperm.xlu0 %292, %v297_v12   ;;  %324 = vrsqrt.f32 %v132_v24  ;;  %vm84_vm15 = vcmp.eq.s32.totalorder %v30_v54, %v404_v37 }
  0x12   :  { %v301_v15 = vpop.eup %300  ;;  %326 = vrsqrt.f32 %v150_v34  ;;  %vm80_vm11 = vcmp.eq.s32.totalorder %v26_v22, %v404_v37 }
  0x13   :  { %v303_v17 = vpop.eup %302  ;;  %v96_v48 = vsel %vm80_vm11, 1.0, %v329_v40 }
  0x14   :  { %169 = vperm.xlu1 %293, %v299_v13   ;;  %v305_v19 = vpop.eup %304  ;;  %v106_v13 = vadd.f32 %v90_v3, %v58_v4 }
  0x15   :  { %159 = vperm.xlu0 %292, %v301_v15   ;;  %v307_v21 = vpop.eup %306  ;;  %v61_v15 = vld [vmem:[%s570_s0 + $0x38] sm:$0xff] }
  0x16   :  { %v309_v23 = vpop.eup %308 }
  0x17   :  { %v311_v25 = vpop.eup %310 }
  0x18   :  { %179 = vperm.xlu1 %293, %v303_v17   ;;  %v313_v26 = vpop.eup %312  ;;  %v92_v17 = vsel %vm76_vm7, 1.0, %v329_v40 }
  0x19   :  { %174 = vperm.xlu0 %292, %v305_v19   ;;  %v315_v27 = vpop.eup %314  ;;  %v27_v19 = vadd.s32 88, %v401_v35 }
  0x1a   :  { %v317_v28 = vpop.eup %316 }
  0x1b   :  { %v319_v29 = vpop.eup %318  ;;  %vm81_vm10 = vcmp.eq.s32.totalorder %v27_v19, %v404_v37 }
  0x1c   :  { %189 = vperm.xlu1 %293, %v307_v21   ;;  %v321_v30 = vpop.eup %320  ;;  %v97_v45 = vsel %vm81_vm10, 1.0, %v329_v40 }
  0x1d   :  { %184 = vperm.xlu0 %292, %v309_v23   ;;  %v323_v31 = vpop.eup %322 }
  0x1e   :  { %v325_v32 = vpop.eup %324 }
  0x1f   :  { %v327_v47 = vpop.eup %326 }
  0x20   :  { %199 = vperm.xlu1 %293, %v311_v25   ;;  %v428_v53 = vrot.slane %v327_v47, %v251_v43  ;;  %v109_v25 = vadd.f32 %v93_v14, %v61_v15 }
  0x21   :  { %194 = vperm.xlu0 %292, %v313_v26  }
  0x24   :  { %209 = vperm.xlu1 %293, %v315_v27   ;;  %v108_v27 = vadd.f32 %v92_v17, %v60_v18 }
  0x25   :  { %204 = vperm.xlu0 %292, %v317_v28   ;;  %v95_v28 = vsel %vm79_vm8, 1.0, %v329_v40 }
  0x28   :  { %219 = vperm.xlu1 %293, %v319_v29   ;;  %v63_v29 = vld [vmem:[%s570_s0 + $0x48] sm:$0xff] }
  0x29   :  { %214 = vperm.xlu0 %292, %v321_v30   ;;  %v111_v42 = vadd.f32 %v95_v28, %v63_v29 }
  0x2c   :  { %229 = vperm.xlu1 %293, %v323_v31   ;;  %v94_v31 = vsel %vm78_vm9, 1.0, %v329_v40 }
  0x2d   :  { %224 = vperm.xlu0 %292, %v325_v32   ;;  %v62_v32 = vld [vmem:[%s570_s0 + $0x40] sm:$0xff] }
  0x2e   :  { %v110_v44 = vadd.f32 %v94_v31, %v62_v32 }
  0x8b   :  { %v165_v57 = vpop.permute.xlu1 %164 }
  0x8c   :  { %v234_v59 = vmul.f32 %v165_v57, %v104_v49  ;;  %v155_v60 = vpop.permute.xlu0 %154  ;;  %v64_v49 = vld [vmem:[%s570_s0 + $0x50] sm:$0xff]  ;;  %v113_v57 = vadd.f32 %v97_v45, %v65_v46 }
  0x8d   :  { %v232_v62 = vmul.f32 %v155_v60, %v102_v50  ;;  %v31_v50 = vadd.s32 120, %v401_v35  ;;  %v99_v60 = vsel %vm83_vm12, 1.0, %v329_v40 }
  0x8e   :  { %v256_v2 = vmul.f32 %v428_v53, %v234_v59  ;;  %v112_v59 = vadd.f32 %v96_v48, %v64_v49 }
  0x8f   :  { %v254_v6 = vmul.f32 %v428_v53, %v232_v62  ;;  %v170_v7 = vpop.permute.xlu1 %169  ;;  %v98_v62 = vsel %vm82_vm13, 1.0, %v329_v40  ;;  %vm85_vm14 = vcmp.eq.s32.totalorder %v31_v50, %v404_v37 }
  0x90   :  { %272 = vst [vmem:[%s571_s3 + $0x10] sm:$0xff] %v256_v2  ;;  %v235_v9 = vmul.f32 %v170_v7, %v105_v61  ;;  %v160_v10 = vpop.permute.xlu0 %159  ;;  %v67_v61 = vld [vmem:[%s570_s0 + $0x68] sm:$0xff]  ;;  %v101_v7 = vsel %vm85_vm14, 1.0, %v329_v40 }
  0x91   :  { %270 = vst [vmem:[%s571_s3] sm:$0xff] %v254_v6  ;;  %v233_v12 = vmul.f32 %v160_v10, %v103_v63  ;;  %v66_v63 = vld [vmem:[%s570_s0 + $0x60] sm:$0xff]  ;;  %v115_v4 = vadd.f32 %v99_v60, %v67_v61  ;;  %v68_v10 = vld [vmem:[%s570_s0 + $0x70] sm:$0xff]  ;;  %v117_v15 = vadd.f32 %v101_v7, %v69_v8 }
  0x92   :  { %v257_v16 = vmul.f32 %v428_v53, %v235_v9  ;;  %v114_v6 = vadd.f32 %v98_v62, %v66_v63  ;;  %v100_v9 = vsel %vm84_vm15, 1.0, %v329_v40 }
  0x93   :  { %v255_v20 = vmul.f32 %v428_v53, %v233_v12  ;;  %v180_v21 = vpop.permute.xlu1 %179  ;;  %v116_v40 = vadd.f32 %v100_v9, %v68_v10 }
  0x94   :  { %273 = vst [vmem:[%s571_s3 + $0x18] sm:$0xff] %v257_v16  ;;  %v237_v23 = vmul.f32 %v180_v21, %v107_v11  ;;  %v175_v24 = vpop.permute.xlu0 %174 }
  0x95   :  { %271 = vst [vmem:[%s571_s3 + $0x8] sm:$0xff] %v255_v20  ;;  %v236_v26 = vmul.f32 %v175_v24, %v106_v13 }
  0x96   :  { %v259_v30 = vmul.f32 %v428_v53, %v237_v23 }
  0x97   :  { %v258_v34 = vmul.f32 %v428_v53, %v236_v26  ;;  %v190_v36 = vpop.permute.xlu1 %189 }
  0x98   :  { %275 = vst [vmem:[%s571_s3 + $0x28] sm:$0xff] %v259_v30  ;;  %v239_v39 = vmul.f32 %v190_v36, %v109_v25  ;;  %v185_v41 = vpop.permute.xlu0 %184 }
  0x99   :  { %274 = vst [vmem:[%s571_s3 + $0x20] sm:$0xff] %v258_v34  ;;  %v238_v43 = vmul.f32 %v185_v41, %v108_v27 }
  0x9a   :  { %v261_v47 = vmul.f32 %v428_v53, %v239_v39 }
  0x9b   :  { %v260_v51 = vmul.f32 %v428_v53, %v238_v43  ;;  %v200_v52 = vpop.permute.xlu1 %199 }
  0x9c   :  { %277 = vst [vmem:[%s571_s3 + $0x38] sm:$0xff] %v261_v47  ;;  %v241_v55 = vmul.f32 %v200_v52, %v111_v42  ;;  %v195_v56 = vpop.permute.xlu0 %194 }
  0x9d   :  { %276 = vst [vmem:[%s571_s3 + $0x30] sm:$0xff] %v260_v51  ;;  %v240_v58 = vmul.f32 %v195_v56, %v110_v44 }
  0x9e   :  { %v263_v35 = vmul.f32 %v428_v53, %v241_v55 }
  0x9f   :  { %v262_v0 = vmul.f32 %v428_v53, %v240_v58  ;;  %v210_v1 = vpop.permute.xlu1 %209 }
  0xa0   :  { %279 = vst [vmem:[%s571_s3 + $0x48] sm:$0xff] %v263_v35  ;;  %v243_v2 = vmul.f32 %v210_v1, %v113_v57  ;;  %v205_v3 = vpop.permute.xlu0 %204 }
  0xa1   :  { %278 = vst [vmem:[%s571_s3 + $0x40] sm:$0xff] %v262_v0  ;;  %v242_v5 = vmul.f32 %v205_v3, %v112_v59 }
  0xa2   :  { %v265_v37 = vmul.f32 %v428_v53, %v243_v2 }
  0xa3   :  { %v264_v11 = vmul.f32 %v428_v53, %v242_v5  ;;  %v220_v12 = vpop.permute.xlu1 %219 }
  0xa4   :  { %281 = vst [vmem:[%s571_s3 + $0x58] sm:$0xff] %v265_v37  ;;  %v245_v13 = vmul.f32 %v220_v12, %v115_v4  ;;  %v215_v14 = vpop.permute.xlu0 %214 }
  0xa5   :  { %280 = vst [vmem:[%s571_s3 + $0x50] sm:$0xff] %v264_v11  ;;  %v244_v16 = vmul.f32 %v215_v14, %v114_v6 }
  0xa6   :  { %v267_v17 = vmul.f32 %v428_v53, %v245_v13 }
  0xa7   :  { %v266_v18 = vmul.f32 %v428_v53, %v244_v16  ;;  %v230_v19 = vpop.permute.xlu1 %229 }
  0xa8   :  { %283 = vst [vmem:[%s571_s3 + $0x68] sm:$0xff] %v267_v17  ;;  %v247_v20 = vmul.f32 %v230_v19, %v117_v15  ;;  %v225_v21 = vpop.permute.xlu0 %224 }
  0xa9   :  { %282 = vst [vmem:[%s571_s3 + $0x60] sm:$0xff] %v266_v18  ;;  %v246_v22 = vmul.f32 %v225_v21, %v116_v40 }
  0xaa   :  { %v269_v23 = vmul.f32 %v428_v53, %v247_v20 }
  0xab   :  { %v268_v24 = vmul.f32 %v428_v53, %v246_v22 }
  0xac   :  { %285 = vst [vmem:[%s571_s3 + $0x78] sm:$0xff] %v269_v23 }
  0xad   :  { %284 = vst [vmem:[%s571_s3 + $0x70] sm:$0xff] %v268_v24 }

// kernel: resgcn_forward.14
= control target key start
LH: loop header
LB: loop body
LE: loop exit
PB: predicated region body
PF: predicated region fallthrough
CT: control target
= control target key end

     0   :  { %vm12_vm0 = vcmask 7168   ;;  %v166_v2 = vmov 1.0   ;;  %s321_s0 = inlined_call_operand.vmem [shape: f32[128,128], index: 0, kind: input, shape index: {}]   ;;  %s322_s1 = inlined_call_operand.vmem [shape: f32[128,1], index: 1, kind: output, shape index: {}]  }
   0x1   :  { %v47_v0 = vld [vmem:[%s321_s0 + $0x10] sm:$0xff]  ;;  %v45_v1 = vld [vmem:[%s321_s0] sm:$0xff]  ;;  %15 = vst.msk [vmem:[#allocation2 + $0x10] sm:$0xff] %vm12_vm0, %v166_v2  ;;  %13 = vst.msk [vmem:[#allocation2] sm:$0xff] %vm12_vm0, %v166_v2 }
   0x2   :  { %14 = vst.msk [vmem:[#allocation2 + $0x8] sm:$0xff] %vm12_vm0, %v166_v2  ;;  %16 = vst.msk [vmem:[#allocation2 + $0x18] sm:$0xff] %vm12_vm0, %v166_v2  ;;  %65 = vadd.xlane.f32.xlu1 %v47_v0  ;;  %61 = vadd.xlane.f32.xlu0 %v45_v1  ;;  %v48_v3 = vld [vmem:[%s321_s0 + $0x18] sm:$0xff]  ;;  %v46_v4 = vld [vmem:[%s321_s0 + $0x8] sm:$0xff] }
   0x3   :  { %17 = vst.msk [vmem:[#allocation2 + $0x20] sm:$0xff] %vm12_vm0, %v166_v2  ;;  %18 = vst.msk [vmem:[#allocation2 + $0x28] sm:$0xff] %vm12_vm0, %v166_v2  ;;  %v50_v5 = vld [vmem:[%s321_s0 + $0x28] sm:$0xff]  ;;  %v49_v6 = vld [vmem:[%s321_s0 + $0x20] sm:$0xff] }
   0x4   :  { %19 = vst.msk [vmem:[#allocation2 + $0x30] sm:$0xff] %vm12_vm0, %v166_v2  ;;  %20 = vst.msk [vmem:[#allocation2 + $0x38] sm:$0xff] %vm12_vm0, %v166_v2  ;;  %v52_v7 = vld [vmem:[%s321_s0 + $0x38] sm:$0xff]  ;;  %v51_v8 = vld [vmem:[%s321_s0 + $0x30] sm:$0xff] }
   0x5   :  { %21 = vst.msk [vmem:[#allocation2 + $0x40] sm:$0xff] %vm12_vm0, %v166_v2  ;;  %22 = vst.msk [vmem:[#allocation2 + $0x48] sm:$0xff] %vm12_vm0, %v166_v2  ;;  %v54_v9 = vld [vmem:[%s321_s0 + $0x48] sm:$0xff]  ;;  %v53_v10 = vld [vmem:[%s321_s0 + $0x40] sm:$0xff] }
   0x6   :  { %23 = vst.msk [vmem:[#allocation2 + $0x50] sm:$0xff] %vm12_vm0, %v166_v2  ;;  %24 = vst.msk [vmem:[#allocation2 + $0x58] sm:$0xff] %vm12_vm0, %v166_v2  ;;  %67 = vadd.xlane.f32.xlu1 %v48_v3  ;;  %63 = vadd.xlane.f32.xlu0 %v46_v4  ;;  %v56_v11 = vld [vmem:[%s321_s0 + $0x58] sm:$0xff]  ;;  %v55_v12 = vld [vmem:[%s321_s0 + $0x50] sm:$0xff] }
   0x7   :  { %25 = vst.msk [vmem:[#allocation2 + $0x60] sm:$0xff] %vm12_vm0, %v166_v2  ;;  %26 = vst.msk [vmem:[#allocation2 + $0x68] sm:$0xff] %vm12_vm0, %v166_v2  ;;  %v58_v13 = vld [vmem:[%s321_s0 + $0x68] sm:$0xff]  ;;  %v57_v14 = vld [vmem:[%s321_s0 + $0x60] sm:$0xff] }
   0x8   :  { %27 = vst.msk [vmem:[#allocation2 + $0x70] sm:$0xff] %vm12_vm0, %v166_v2  ;;  %28 = vst.msk [vmem:[#allocation2 + $0x78] sm:$0xff] %vm12_vm0, %v166_v2  ;;  %v60_v15 = vld [vmem:[%s321_s0 + $0x78] sm:$0xff]  ;;  %v59_v16 = vld [vmem:[%s321_s0 + $0x70] sm:$0xff] }
   0x9   :  { %v31_v17 = vld [vmem:[#allocation2 + $0x10] sm:$0xff]  ;;  %v29_v18 = vld [vmem:[#allocation2] sm:$0xff]  ;;  %v32_v23 = vld [vmem:[#allocation2 + $0x18] sm:$0xff] }
   0xa   :  { %71 = vadd.xlane.f32.xlu1 %v50_v5  ;;  %69 = vadd.xlane.f32.xlu0 %v49_v6  ;;  %v30_v24 = vld [vmem:[#allocation2 + $0x8] sm:$0xff]  ;;  %v33_v30 = vld [vmem:[#allocation2 + $0x20] sm:$0xff] }
   0xb   :  { %v34_v29 = vld [vmem:[#allocation2 + $0x28] sm:$0xff]  ;;  %v36_v35 = vld [vmem:[#allocation2 + $0x38] sm:$0xff]  ;;  %v35_v38 = vld [vmem:[#allocation2 + $0x30] sm:$0xff] }
   0xc   :  { %v38_v43 = vld [vmem:[#allocation2 + $0x48] sm:$0xff]  ;;  %v37_v46 = vld [vmem:[#allocation2 + $0x40] sm:$0xff] }
   0xd   :  { %v40_v51 = vld [vmem:[#allocation2 + $0x58] sm:$0xff]  ;;  %v39_v54 = vld [vmem:[#allocation2 + $0x50] sm:$0xff] }
   0xe   :  { %75 = vadd.xlane.f32.xlu1 %v52_v7  ;;  %73 = vadd.xlane.f32.xlu0 %v51_v8  ;;  %v42_v59 = vld [vmem:[#allocation2 + $0x68] sm:$0xff]  ;;  %v41_v62 = vld [vmem:[#allocation2 + $0x60] sm:$0xff] }
   0xf   :  { %v44_v3 = vld [vmem:[#allocation2 + $0x78] sm:$0xff]  ;;  %v43_v6 = vld [vmem:[#allocation2 + $0x70] sm:$0xff] }
  0x12   :  { %79 = vadd.xlane.f32.xlu1 %v54_v9  ;;  %77 = vadd.xlane.f32.xlu0 %v53_v10 }
  0x16   :  { %83 = vadd.xlane.f32.xlu1 %v56_v11  ;;  %81 = vadd.xlane.f32.xlu0 %v55_v12 }
  0x1a   :  { %87 = vadd.xlane.f32.xlu1 %v58_v13  ;;  %85 = vadd.xlane.f32.xlu0 %v57_v14 }
  0x1e   :  { %91 = vadd.xlane.f32.xlu1 %v60_v15  ;;  %89 = vadd.xlane.f32.xlu0 %v59_v16 }
  0x8b   :  { %v66_v19 = vpop.xlane.xlu1 %65  ;;  %v62_v20 = vpop.xlane.xlu0 %61 }
  0x8c   :  { %v95_v21 = vadd.f32 %v66_v19, %v31_v17  ;;  %v93_v22 = vadd.f32 %v62_v20, %v29_v18 }
  0x8e   :  { %112 = vst.msk [vmem:[#allocation2 + $0x10] sm:$0xff] %vm12_vm0, %v95_v21  ;;  %110 = vst.msk [vmem:[#allocation2] sm:$0xff] %vm12_vm0, %v93_v22 }
  0x8f   :  { %v68_v25 = vpop.xlane.xlu1 %67  ;;  %v64_v26 = vpop.xlane.xlu0 %63 }
  0x90   :  { %v96_v27 = vadd.f32 %v68_v25, %v32_v23  ;;  %v94_v28 = vadd.f32 %v64_v26, %v30_v24 }
  0x92   :  { %113 = vst.msk [vmem:[#allocation2 + $0x18] sm:$0xff] %vm12_vm0, %v96_v27  ;;  %111 = vst.msk [vmem:[#allocation2 + $0x8] sm:$0xff] %vm12_vm0, %v94_v28 }
  0x93   :  { %v72_v31 = vpop.xlane.xlu1 %71  ;;  %v70_v32 = vpop.xlane.xlu0 %69 }
  0x94   :  { %v98_v33 = vadd.f32 %v72_v31, %v34_v29  ;;  %v97_v34 = vadd.f32 %v70_v32, %v33_v30 }
  0x95   :  { %v131_v36 = vld [vmem:[#allocation2 + $0x10] sm:$0xff]  ;;  %v129_v37 = vld [vmem:[#allocation2] sm:$0xff] }
  0x96   :  { %147 = vst.msk [vmem:[%s322_s1 + $0x10] sm:$0xff] %vm12_vm0, %v131_v36  ;;  %145 = vst.msk [vmem:[%s322_s1] sm:$0xff] %vm12_vm0, %v129_v37 }
  0x97   :  { %115 = vst.msk [vmem:[#allocation2 + $0x28] sm:$0xff] %vm12_vm0, %v98_v33  ;;  %114 = vst.msk [vmem:[#allocation2 + $0x20] sm:$0xff] %vm12_vm0, %v97_v34  ;;  %v76_v39 = vpop.xlane.xlu1 %75  ;;  %v74_v40 = vpop.xlane.xlu0 %73 }
  0x98   :  { %v100_v41 = vadd.f32 %v76_v39, %v36_v35  ;;  %v99_v42 = vadd.f32 %v74_v40, %v35_v38 }
  0x99   :  { %v132_v44 = vld [vmem:[#allocation2 + $0x18] sm:$0xff]  ;;  %v130_v45 = vld [vmem:[#allocation2 + $0x8] sm:$0xff] }
  0x9a   :  { %148 = vst.msk [vmem:[%s322_s1 + $0x18] sm:$0xff] %vm12_vm0, %v132_v44  ;;  %146 = vst.msk [vmem:[%s322_s1 + $0x8] sm:$0xff] %vm12_vm0, %v130_v45 }
  0x9b   :  { %117 = vst.msk [vmem:[#allocation2 + $0x38] sm:$0xff] %vm12_vm0, %v100_v41  ;;  %116 = vst.msk [vmem:[#allocation2 + $0x30] sm:$0xff] %vm12_vm0, %v99_v42  ;;  %v80_v47 = vpop.xlane.xlu1 %79  ;;  %v78_v48 = vpop.xlane.xlu0 %77 }
  0x9c   :  { %v102_v49 = vadd.f32 %v80_v47, %v38_v43  ;;  %v101_v50 = vadd.f32 %v78_v48, %v37_v46 }
  0x9e   :  { %v134_v52 = vld [vmem:[#allocation2 + $0x28] sm:$0xff]  ;;  %v133_v53 = vld [vmem:[#allocation2 + $0x20] sm:$0xff]  ;;  %119 = vst.msk [vmem:[#allocation2 + $0x48] sm:$0xff] %vm12_vm0, %v102_v49  ;;  %118 = vst.msk [vmem:[#allocation2 + $0x40] sm:$0xff] %vm12_vm0, %v101_v50 }
  0x9f   :  { %150 = vst.msk [vmem:[%s322_s1 + $0x28] sm:$0xff] %vm12_vm0, %v134_v52  ;;  %149 = vst.msk [vmem:[%s322_s1 + $0x20] sm:$0xff] %vm12_vm0, %v133_v53  ;;  %v84_v55 = vpop.xlane.xlu1 %83  ;;  %v82_v56 = vpop.xlane.xlu0 %81 }
  0xa0   :  { %v104_v57 = vadd.f32 %v84_v55, %v40_v51  ;;  %v103_v58 = vadd.f32 %v82_v56, %v39_v54 }
  0xa2   :  { %v136_v60 = vld [vmem:[#allocation2 + $0x38] sm:$0xff]  ;;  %v135_v61 = vld [vmem:[#allocation2 + $0x30] sm:$0xff]  ;;  %121 = vst.msk [vmem:[#allocation2 + $0x58] sm:$0xff] %vm12_vm0, %v104_v57  ;;  %120 = vst.msk [vmem:[#allocation2 + $0x50] sm:$0xff] %vm12_vm0, %v103_v58 }
  0xa3   :  { %152 = vst.msk [vmem:[%s322_s1 + $0x38] sm:$0xff] %vm12_vm0, %v136_v60  ;;  %151 = vst.msk [vmem:[%s322_s1 + $0x30] sm:$0xff] %vm12_vm0, %v135_v61  ;;  %v88_v63 = vpop.xlane.xlu1 %87  ;;  %v86_v0 = vpop.xlane.xlu0 %85 }
  0xa4   :  { %v106_v1 = vadd.f32 %v88_v63, %v42_v59  ;;  %v105_v2 = vadd.f32 %v86_v0, %v41_v62 }
  0xa5   :  { %v138_v4 = vld [vmem:[#allocation2 + $0x48] sm:$0xff]  ;;  %v137_v5 = vld [vmem:[#allocation2 + $0x40] sm:$0xff] }
  0xa6   :  { %154 = vst.msk [vmem:[%s322_s1 + $0x48] sm:$0xff] %vm12_vm0, %v138_v4  ;;  %153 = vst.msk [vmem:[%s322_s1 + $0x40] sm:$0xff] %vm12_vm0, %v137_v5 }
  0xa7   :  { %123 = vst.msk [vmem:[#allocation2 + $0x68] sm:$0xff] %vm12_vm0, %v106_v1  ;;  %122 = vst.msk [vmem:[#allocation2 + $0x60] sm:$0xff] %vm12_vm0, %v105_v2  ;;  %v92_v7 = vpop.xlane.xlu1 %91  ;;  %v90_v8 = vpop.xlane.xlu0 %89 }
  0xa8   :  { %v108_v9 = vadd.f32 %v92_v7, %v44_v3  ;;  %v107_v10 = vadd.f32 %v90_v8, %v43_v6 }
  0xa9   :  { %v140_v11 = vld [vmem:[#allocation2 + $0x58] sm:$0xff]  ;;  %v139_v12 = vld [vmem:[#allocation2 + $0x50] sm:$0xff] }
  0xaa   :  { %156 = vst.msk [vmem:[%s322_s1 + $0x58] sm:$0xff] %vm12_vm0, %v140_v11  ;;  %155 = vst.msk [vmem:[%s322_s1 + $0x50] sm:$0xff] %vm12_vm0, %v139_v12 }
  0xab   :  { %125 = vst.msk [vmem:[#allocation2 + $0x78] sm:$0xff] %vm12_vm0, %v108_v9  ;;  %124 = vst.msk [vmem:[#allocation2 + $0x70] sm:$0xff] %vm12_vm0, %v107_v10 }
  0xae   :  { %v142_v13 = vld [vmem:[#allocation2 + $0x68] sm:$0xff]  ;;  %v141_v14 = vld [vmem:[#allocation2 + $0x60] sm:$0xff] }
  0xaf   :  { %158 = vst.msk [vmem:[%s322_s1 + $0x68] sm:$0xff] %vm12_vm0, %v142_v13  ;;  %157 = vst.msk [vmem:[%s322_s1 + $0x60] sm:$0xff] %vm12_vm0, %v141_v14 }
  0xb2   :  { %v144_v15 = vld [vmem:[#allocation2 + $0x78] sm:$0xff]  ;;  %v143_v16 = vld [vmem:[#allocation2 + $0x70] sm:$0xff] }
  0xb3   :  { %160 = vst.msk [vmem:[%s322_s1 + $0x78] sm:$0xff] %vm12_vm0, %v144_v15  ;;  %159 = vst.msk [vmem:[%s322_s1 + $0x70] sm:$0xff] %vm12_vm0, %v143_v16 }

// kernel: resgcn_forward.23
= control target key start
LH: loop header
LB: loop body
LE: loop exit
PB: predicated region body
PF: predicated region fallthrough
CT: control target
= control target key end

     0   :  { %s400_s1 = inlined_call_operand.vmem [shape: f32[128,128], index: 1, kind: input, shape index: {}, may-alias: {0,1}]   ;;  %s401_s0 = inlined_call_operand.vmem [shape: f32[128,128], index: 0, kind: input, shape index: {}, may-alias: {0,1}]   ;;  %s402_s2 = inlined_call_operand.vmem [shape: f32[128,128], index: 2, kind: output, shape index: {}]  }
   0x1   :  { %v50_v0 = vld [vmem:[%s400_s1 + $0x70] sm:$0xff]  ;;  %v51_v1 = vld [vmem:[%s400_s1 + $0x78] sm:$0xff]  ;;  %v48_v2 = vld [vmem:[%s400_s1 + $0x60] sm:$0xff] }
   0x2   :  { %v59_v3 = vpack.c.bf16 %v51_v1, %v50_v0  ;;  %v49_v4 = vld [vmem:[%s400_s1 + $0x68] sm:$0xff]  ;;  %v46_v6 = vld [vmem:[%s400_s1 + $0x50] sm:$0xff]  ;;  %v12_v7 = vld [vmem:[%s401_s0] sm:$0xff] }
   0x3   :  { %v58_v5 = vpack.c.bf16 %v49_v4, %v48_v2  ;;  %v13_v8 = vld [vmem:[%s401_s0 + $0x8] sm:$0xff]  ;;  %v47_v9 = vld [vmem:[%s400_s1 + $0x58] sm:$0xff]  ;;  %v20_v11 = vld [vmem:[%s401_s0 + $0x40] sm:$0xff] }
   0x4   :  { %193 = vmatprep.subr.bf16.mxu0 %v59_v3  ;;  %225 = vmatprep.subr.bf16.mxu1 %v59_v3  ;;  %v28_v10 = vpack.c.bf16 %v13_v8, %v12_v7  ;;  %v21_v12 = vld [vmem:[%s401_s0 + $0x48] sm:$0xff]  ;;  %v57_v14 = vpack.c.bf16 %v47_v9, %v46_v6  ;;  %v44_v15 = vld [vmem:[%s400_s1 + $0x40] sm:$0xff]  ;;  %v42_v18 = vld [vmem:[%s400_s1 + $0x30] sm:$0xff] }
   0x5   :  { %194 = vmatpush3.bf16.xpose.msra.mxu0 %v59_v3  ;;  %233 = vmatpush3.bf16.xpose.msra.mxu1 %v59_v3  ;;  %v32_v13 = vpack.c.bf16 %v21_v12, %v20_v11  ;;  %v45_v16 = vld [vmem:[%s400_s1 + $0x48] sm:$0xff]  ;;  %v43_v19 = vld [vmem:[%s400_s1 + $0x38] sm:$0xff]  ;;  %v40_v21 = vld [vmem:[%s400_s1 + $0x20] sm:$0xff] }
   0x6   :  { %195 = vmatprep.subr.bf16.mxu0 %v58_v5  ;;  %226 = vmatprep.subr.bf16.mxu1 %v58_v5  ;;  %v56_v17 = vpack.c.bf16 %v45_v16, %v44_v15  ;;  %v55_v20 = vpack.c.bf16 %v43_v19, %v42_v18  ;;  %v41_v22 = vld [vmem:[%s400_s1 + $0x28] sm:$0xff]  ;;  %v38_v24 = vld [vmem:[%s400_s1 + $0x10] sm:$0xff]  ;;  %v39_v25 = vld [vmem:[%s400_s1 + $0x18] sm:$0xff] }
   0x7   :  { %209 = vmatprep.mubr.bf16.mxu0 %v28_v10  ;;  %217 = vmatprep.mubr.bf16.mxu1 %v32_v13  ;;  %v54_v23 = vpack.c.bf16 %v41_v22, %v40_v21  ;;  %v53_v26 = vpack.c.bf16 %v39_v25, %v38_v24  ;;  %v36_v27 = vld [vmem:[%s400_s1] sm:$0xff]  ;;  %v37_v28 = vld [vmem:[%s400_s1 + $0x8] sm:$0xff]  ;;  %v14_v30 = vld [vmem:[%s401_s0 + $0x10] sm:$0xff] }
   0x8   :  { %v52_v29 = vpack.c.bf16 %v37_v28, %v36_v27  ;;  %v15_v31 = vld [vmem:[%s401_s0 + $0x18] sm:$0xff]  ;;  %v22_v32 = vld [vmem:[%s401_s0 + $0x50] sm:$0xff]  ;;  %v16_v34 = vld [vmem:[%s401_s0 + $0x20] sm:$0xff] }
   0x9   :  { %v23_v33 = vld [vmem:[%s401_s0 + $0x58] sm:$0xff]  ;;  %v17_v35 = vld [vmem:[%s401_s0 + $0x28] sm:$0xff]  ;;  %v24_v36 = vld [vmem:[%s401_s0 + $0x60] sm:$0xff]  ;;  %v29_v38 = vpack.c.bf16 %v15_v31, %v14_v30 }
   0xa   :  { %v25_v37 = vld [vmem:[%s401_s0 + $0x68] sm:$0xff]  ;;  %v33_v39 = vpack.c.bf16 %v23_v33, %v22_v32  ;;  %v30_v40 = vpack.c.bf16 %v17_v35, %v16_v34  ;;  %v18_v42 = vld [vmem:[%s401_s0 + $0x30] sm:$0xff]  ;;  %v19_v43 = vld [vmem:[%s401_s0 + $0x38] sm:$0xff] }
   0xb   :  { %v34_v41 = vpack.c.bf16 %v25_v37, %v24_v36  ;;  %v26_v44 = vld [vmem:[%s401_s0 + $0x70] sm:$0xff]  ;;  %v27_v45 = vld [vmem:[%s401_s0 + $0x78] sm:$0xff]  ;;  %v31_v46 = vpack.c.bf16 %v19_v43, %v18_v42 }
   0xc   :  { %v35_v47 = vpack.c.bf16 %v27_v45, %v26_v44 }
   0xd   :  { %196 = vmatpush3.bf16.xpose.msra.mxu0 %v58_v5  ;;  %234 = vmatpush3.bf16.xpose.msra.mxu1 %v58_v5 }
   0xe   :  { %197 = vmatprep.subr.bf16.mxu0 %v57_v14  ;;  %227 = vmatprep.subr.bf16.mxu1 %v57_v14 }
  0x15   :  { %198 = vmatpush3.bf16.xpose.msra.mxu0 %v57_v14  ;;  %235 = vmatpush3.bf16.xpose.msra.mxu1 %v57_v14 }
  0x16   :  { %199 = vmatprep.subr.bf16.mxu0 %v56_v17  ;;  %228 = vmatprep.subr.bf16.mxu1 %v56_v17 }
  0x1d   :  { %200 = vmatpush3.bf16.xpose.msra.mxu0 %v56_v17  ;;  %236 = vmatpush3.bf16.xpose.msra.mxu1 %v56_v17 }
  0x1e   :  { %201 = vmatprep.subr.bf16.mxu0 %v55_v20  ;;  %229 = vmatprep.subr.bf16.mxu1 %v55_v20 }
  0x25   :  { %202 = vmatpush3.bf16.xpose.msra.mxu0 %v55_v20  ;;  %237 = vmatpush3.bf16.xpose.msra.mxu1 %v55_v20 }
  0x26   :  { %203 = vmatprep.subr.bf16.mxu0 %v54_v23  ;;  %230 = vmatprep.subr.bf16.mxu1 %v54_v23 }
  0x2d   :  { %204 = vmatpush3.bf16.xpose.msra.mxu0 %v54_v23  ;;  %238 = vmatpush3.bf16.xpose.msra.mxu1 %v54_v23 }
  0x2e   :  { %205 = vmatprep.subr.bf16.mxu0 %v53_v26  ;;  %231 = vmatprep.subr.bf16.mxu1 %v53_v26 }
  0x35   :  { %206 = vmatpush3.bf16.xpose.msra.mxu0 %v53_v26  ;;  %239 = vmatpush3.bf16.xpose.msra.mxu1 %v53_v26 }
  0x36   :  { %207 = vmatprep.subr.bf16.mxu0 %v52_v29  ;;  %232 = vmatprep.subr.bf16.mxu1 %v52_v29 }
  0x3d   :  { %208 = vmatpush3.bf16.xpose.msra.mxu0 %v52_v29  ;;  %240 = vmatpush3.bf16.xpose.msra.mxu1 %v52_v29 }
  0x44   :  { %210 = vmatmul.mubr.bf16.vlgmr.msra.gmra.mxu0 %v29_v38  ;;  %218 = vmatmul.mubr.bf16.vlgmr.msra.gmra.mxu1 %v33_v39 }
  0x45   :  { %213 = vmatprep.mubr.bf16.mxu0 %v30_v40  ;;  %221 = vmatprep.mubr.bf16.mxu1 %v34_v41 }
  0x4c   :  { %214 = vmatmul.mubr.bf16.gmra.mxu0 %v31_v46  ;;  %222 = vmatmul.mubr.bf16.gmra.mxu1 %v35_v47 }
 0x104   :  { %v211_v48 = vpop.f32.mrf.mxu0  ;;  %v219_v49 = vpop.f32.mrf.mxu1 }
 0x105   :  { %159 = vst [vmem:[%s402_s2 + $0x10] sm:$0xff] %v211_v48  ;;  %167 = vst [vmem:[%s402_s2 + $0x50] sm:$0xff] %v219_v49 }
 0x106   :  { %v94_v50 = vpop.f32.mrf.mxu0  ;;  %v126_v51 = vpop.f32.mrf.mxu1 }
 0x107   :  { %157 = vst [vmem:[%s402_s2] sm:$0xff] %v94_v50  ;;  %165 = vst [vmem:[%s402_s2 + $0x40] sm:$0xff] %v126_v51 }
 0x108   :  { %v212_v52 = vpop.f32.mrf.mxu0  ;;  %v220_v53 = vpop.f32.mrf.mxu1 }
 0x109   :  { %160 = vst [vmem:[%s402_s2 + $0x18] sm:$0xff] %v212_v52  ;;  %168 = vst [vmem:[%s402_s2 + $0x58] sm:$0xff] %v220_v53 }
 0x10a   :  { %v97_v54 = vpop.f32.mrf.mxu0  ;;  %v129_v55 = vpop.f32.mrf.mxu1 }
 0x10b   :  { %158 = vst [vmem:[%s402_s2 + $0x8] sm:$0xff] %v97_v54  ;;  %166 = vst [vmem:[%s402_s2 + $0x48] sm:$0xff] %v129_v55 }
 0x10c   :  { %v215_v56 = vpop.f32.mrf.mxu0  ;;  %v223_v57 = vpop.f32.mrf.mxu1 }
 0x10d   :  { %163 = vst [vmem:[%s402_s2 + $0x30] sm:$0xff] %v215_v56  ;;  %171 = vst [vmem:[%s402_s2 + $0x70] sm:$0xff] %v223_v57 }
 0x10e   :  { %v110_v58 = vpop.f32.mrf.mxu0  ;;  %v142_v59 = vpop.f32.mrf.mxu1 }
 0x10f   :  { %161 = vst [vmem:[%s402_s2 + $0x20] sm:$0xff] %v110_v58  ;;  %169 = vst [vmem:[%s402_s2 + $0x60] sm:$0xff] %v142_v59 }
 0x110   :  { %v216_v60 = vpop.f32.mrf.mxu0  ;;  %v224_v61 = vpop.f32.mrf.mxu1 }
 0x111   :  { %164 = vst [vmem:[%s402_s2 + $0x38] sm:$0xff] %v216_v60  ;;  %172 = vst [vmem:[%s402_s2 + $0x78] sm:$0xff] %v224_v61 }
 0x112   :  { %v113_v62 = vpop.f32.mrf.mxu0  ;;  %v145_v63 = vpop.f32.mrf.mxu1 }
 0x113   :  { %162 = vst [vmem:[%s402_s2 + $0x28] sm:$0xff] %v113_v62  ;;  %170 = vst [vmem:[%s402_s2 + $0x68] sm:$0xff] %v145_v63 }

</bundles_post_ra>
